<compile_context>
chip_gen: v5e
topology: v5e:2x2
jax: 0.10.0
libtpu: 0.0.40
codegen_flags: <defaults>
</compile_context>

<pallas_src>
import functools
import numpy as np
import jax
import jax.numpy as jnp
from jax import lax
from jax.experimental import pallas as pl
from jax.experimental.pallas import tpu as pltpu

LN_EPS = 1e-6
NEG_INF = -1e9
VMEM_LIMIT = 48 * 1024 * 1024  # > scoped default on v5e/v6e/v7x, < physical VMEM everywhere


def _cparams(semantics):
    return pltpu.CompilerParams(dimension_semantics=semantics,
                                vmem_limit_bytes=VMEM_LIMIT)


def _layer_norm_f32(y, g, b):
    mean = jnp.mean(y, axis=-1, keepdims=True)
    var = jnp.mean((y - mean) ** 2, axis=-1, keepdims=True)
    return (y - mean) * lax.rsqrt(var + LN_EPS) * g + b


def _attention_heads(q, k, v, keep, ctx_ref, n_head, d_k, d_v, scale):
    """q:(Lq,H*dk) k:(Lk,H*dk) v:(Lk,H*dv) all bf16; keep broadcastable to (Lq,Lk).
    Writes each head's context to ctx_ref (Lq, H*dv) bf16 at a static lane offset."""
    for h in range(n_head):                              # static, unrolled
        qh = q[:, h * d_k:(h + 1) * d_k]
        kh = k[:, h * d_k:(h + 1) * d_k]
        vh = v[:, h * d_v:(h + 1) * d_v]
        # q @ k^T without an explicit transpose: contract last dims on the MXU.
        s = lax.dot_general(qh, kh, (((1,), (1,)), ((), ())),
                            preferred_element_type=jnp.float32) * scale
        s = jnp.where(keep, s, NEG_INF)                  # masked_fill(mask == 0, -1e9)
        s = s - jnp.max(s, axis=-1, keepdims=True)
        p = jnp.exp(s)
        p = p * pl.reciprocal(jnp.sum(p, axis=-1, keepdims=True), approx=True)
        oh = jnp.dot(p.astype(jnp.bfloat16), vh, preferred_element_type=jnp.float32)
        ctx_ref[:, h * d_v:(h + 1) * d_v] = oh.astype(jnp.bfloat16)


# --------------------------- fused self-attention --------------------------- #

def _self_mha_kernel(x_ref, m_ref, wqkv_ref, wo_ref, g_ref, b_ref, o_ref, ctx_ref,
                     *, n_head, d_k, d_v, scale):
    x = x_ref[0]                                         # (L, D) bf16 (query == key/value)
    Hdk = n_head * d_k
    qkv = jnp.dot(x, wqkv_ref[...], preferred_element_type=jnp.float32)
    qkv = qkv.astype(jnp.bfloat16)                       # single cast for q, k, v
    q = qkv[:, :Hdk]
    k = qkv[:, Hdk:2 * Hdk]
    v = qkv[:, 2 * Hdk:]
    keep = m_ref[0] != 0                                 # (L, L) int8 mask
    _attention_heads(q, k, v, keep, ctx_ref, n_head, d_k, d_v, scale)
    attn = jnp.dot(ctx_ref[...], wo_ref[...], preferred_element_type=jnp.float32)
    y = attn + x.astype(jnp.float32)                     # residual (post-LN)
    o_ref[0] = _layer_norm_f32(y, g_ref[...], b_ref[...]).astype(o_ref.dtype)


def pallas_self_mha(x, mask_i8, p, n_head, d_k, d_v):
    B, L, D = x.shape
    Hdk, Hdv = n_head * d_k, n_head * d_v
    kern = functools.partial(_self_mha_kernel, n_head=n_head, d_k=d_k, d_v=d_v,
                             scale=1.0 / float(np.sqrt(d_k)))
    return pl.pallas_call(
        kern,
        out_shape=jax.ShapeDtypeStruct((B, L, D), jnp.bfloat16),
        grid=(B,),
        in_specs=[
            pl.BlockSpec((1, L, L := L) and (1, L, D), lambda b: (b, 0, 0)) if False else
            pl.BlockSpec((1, L, D), lambda b: (b, 0, 0)),          # x (q == kv, DMA'd once)
            pl.BlockSpec((1, L, L), lambda b: (b, 0, 0)),          # int8 self-attn mask
            pl.BlockSpec((D, 2 * Hdk + Hdv), lambda b: (0, 0)),    # fused Wq|Wk|Wv
            pl.BlockSpec((Hdv, D), lambda b: (0, 0)),              # Wo
            pl.BlockSpec((1, D), lambda b: (0, 0)),
            pl.BlockSpec((1, D), lambda b: (0, 0)),
        ],
        out_specs=pl.BlockSpec((1, L, D), lambda b: (b, 0, 0)),
        scratch_shapes=[pltpu.VMEM((L, Hdv), jnp.bfloat16)],       # per-head context slab
        compiler_params=_cparams(("parallel",)),
    )(x, mask_i8, p["wqkv"], p["wo"], p["ln_g"], p["ln_b"])


# --------------------------- fused cross-attention -------------------------- #

def _cross_mha_kernel(x_ref, kv_ref, m_ref, wq_ref, wkv_ref, wo_ref, g_ref, b_ref,
                      o_ref, ctx_ref, *, n_head, d_k, d_v, scale):
    x = x_ref[0]                                         # (tq, D) bf16
    kv = kv_ref[0]                                       # (Lk, D) bf16
    Hdk = n_head * d_k
    q = jnp.dot(x, wq_ref[...], preferred_element_type=jnp.float32).astype(jnp.bfloat16)
    kvp = jnp.dot(kv, wkv_ref[...], preferred_element_type=jnp.float32).astype(jnp.bfloat16)
    k = kvp[:, :Hdk]
    v = kvp[:, Hdk:]
    keep = m_ref[0] != 0                                 # (1, Lk), broadcast over query rows
    _attention_heads(q, k, v, keep, ctx_ref, n_head, d_k, d_v, scale)
    attn = jnp.dot(ctx_ref[...], wo_ref[...], preferred_element_type=jnp.float32)
    y = attn + x.astype(jnp.float32)                     # residual (post-LN)
    o_ref[0] = _layer_norm_f32(y, g_ref[...], b_ref[...]).astype(o_ref.dtype)


def pallas_cross_mha(x, kv, mask_i8, p, n_head, d_k, d_v, tq_pref=256):
    B, Lq, D = x.shape
    Lk = kv.shape[1]
    Hdk, Hdv = n_head * d_k, n_head * d_v
    tq = tq_pref if Lq % tq_pref == 0 else Lq
    kern = functools.partial(_cross_mha_kernel, n_head=n_head, d_k=d_k, d_v=d_v,
                             scale=1.0 / float(np.sqrt(d_k)))
    return pl.pallas_call(
        kern,
        out_shape=jax.ShapeDtypeStruct((B, Lq, D), jnp.bfloat16),
        grid=(B, Lq // tq),
        in_specs=[
            pl.BlockSpec((1, tq, D), lambda b, i: (b, i, 0)),      # query tile
            pl.BlockSpec((1, Lk, D), lambda b, i: (b, 0, 0)),      # encoder output
            pl.BlockSpec((1, 1, Lk), lambda b, i: (b, 0, 0)),      # src mask, natural shape
            pl.BlockSpec((D, Hdk), lambda b, i: (0, 0)),           # Wq
            pl.BlockSpec((D, Hdk + Hdv), lambda b, i: (0, 0)),     # fused Wk|Wv
            pl.BlockSpec((Hdv, D), lambda b, i: (0, 0)),           # Wo
            pl.BlockSpec((1, D), lambda b, i: (0, 0)),
            pl.BlockSpec((1, D), lambda b, i: (0, 0)),
        ],
        out_specs=pl.BlockSpec((1, tq, D), lambda b, i: (b, i, 0)),
        scratch_shapes=[pltpu.VMEM((tq, Hdv), jnp.bfloat16)],
        compiler_params=_cparams(("parallel", "parallel")),
    )(x, kv, mask_i8, p["wq"], p["wkv"], p["wo"], p["ln_g"], p["ln_b"])


# ------------------------------ fused FFN + LN ------------------------------ #

def _ffn_ln_kernel(x_ref, w1_ref, b1_ref, w2_ref, b2_ref, g_ref, b_ref, o_ref):
    x = x_ref[0]                                         # (tm, D) bf16
    h = jnp.dot(x, w1_ref[...], preferred_element_type=jnp.float32) + b1_ref[...]
    h = jnp.maximum(h, 0.0)                              # ReLU in f32
    y = jnp.dot(h.astype(jnp.bfloat16), w2_ref[...],
                preferred_element_type=jnp.float32) + b2_ref[...]
    y = y + x.astype(jnp.float32)                        # residual (post-LN)
    o_ref[0] = _layer_norm_f32(y, g_ref[...], b_ref[...]).astype(o_ref.dtype)


def pallas_ffn_ln(x, p, tm_pref=256):
    B, L, D = x.shape
    Dh = p["w1"].shape[1]
    tm = tm_pref if L % tm_pref == 0 else L
    return pl.pallas_call(
        _ffn_ln_kernel,
        out_shape=jax.ShapeDtypeStruct((B, L, D), jnp.bfloat16),
        grid=(B, L // tm),
        in_specs=[
            pl.BlockSpec((1, tm, D), lambda b, i: (b, i, 0)),
            pl.BlockSpec((D, Dh), lambda b, i: (0, 0)),
            pl.BlockSpec((1, Dh), lambda b, i: (0, 0)),
            pl.BlockSpec((Dh, D), lambda b, i: (0, 0)),
            pl.BlockSpec((1, D), lambda b, i: (0, 0)),
            pl.BlockSpec((1, D), lambda b, i: (0, 0)),
            pl.BlockSpec((1, D), lambda b, i: (0, 0)),
        ],
        out_specs=pl.BlockSpec((1, tm, D), lambda b, i: (b, i, 0)),
        compiler_params=_cparams(("parallel", "parallel")),
    )(x, p["w1"], p["b1"], p["w2"], p["b2"], p["ln_g"], p["ln_b"])


# ------------------- fused embed (exp linear + mask + pos + LN) ------------- #

def _embed_kernel(word_ref, exp_ref, mask_ref, we_ref, be_ref, pos_ref,
                  g_ref, b_ref, o_ref):
    word = word_ref[0]                                   # (L, D) f32
    exp_in = exp_ref[0]                                  # (L, E) f32
    m = mask_ref[0]                                      # (L, 1) f32, >0 where True
    exp_out = jnp.dot(exp_in.astype(jnp.bfloat16), we_ref[...],
                      preferred_element_type=jnp.float32) + be_ref[...]
    x = jnp.where(m > 0, exp_out, word)                  # dec_output[exp_mask] = exp_emb[...]
    x = x + pos_ref[...]                                 # positional encoding
    o_ref[0] = _layer_norm_f32(x, g_ref[...], b_ref[...]).astype(o_ref.dtype)


def pallas_embed_fuse(word_emb, trg_exp, exp_mask, we, be, pos, gamma, beta):
    B, L, D = word_emb.shape
    E = trg_exp.shape[2]
    mask3 = exp_mask.astype(jnp.float32)[:, :, None]     # (B, L, 1)
    return pl.pallas_call(
        _embed_kernel,
        out_shape=jax.ShapeDtypeStruct((B, L, D), jnp.bfloat16),
        grid=(B,),
        in_specs=[
            pl.BlockSpec((1, L, D), lambda b: (b, 0, 0)),
            pl.BlockSpec((1, L, E), lambda b: (b, 0, 0)),
            pl.BlockSpec((1, L, 1), lambda b: (b, 0, 0)),
            pl.BlockSpec((E, D), lambda b: (0, 0)),
            pl.BlockSpec((1, D), lambda b: (0, 0)),
            pl.BlockSpec((L, D), lambda b: (0, 0)),
            pl.BlockSpec((1, D), lambda b: (0, 0)),
            pl.BlockSpec((1, D), lambda b: (0, 0)),
        ],
        out_specs=pl.BlockSpec((1, L, D), lambda b: (b, 0, 0)),
        compiler_params=_cparams(("parallel",)),
    )(word_emb, trg_exp, mask3, we, be, pos, gamma, beta)


# ------------------------------- model glue --------------------------------- #

def sinusoid_table(n_position, d_hid):
    pos = np.arange(n_position)[:, None].astype(np.float64)
    hid = np.arange(d_hid)[None, :]
    angle = pos / np.power(10000, 2 * (hid // 2) / d_hid)
    table = np.zeros((n_position, d_hid), dtype=np.float64)
    table[:, 0::2] = np.sin(angle[:, 0::2])
    table[:, 1::2] = np.cos(angle[:, 1::2])
    return jnp.asarray(table, dtype=jnp.float32)


def decoder_forward(params, trg_seq, trg_mask, trg_exp, exp_mask, enc_output, src_mask,
                    n_head, d_k, d_v):
    B, L = trg_seq.shape
    # embedding gather (XLA glue) + fused [exp linear, mask replace, pos enc, LN]
    word = jnp.take(params["emb_table"], trg_seq, axis=0)        # (B, L, D) f32
    pos = params["pos_table"][:L]                                # (L, D)
    x = pallas_embed_fuse(word, trg_exp, exp_mask,
                          params["exp_w"], params["exp_b"], pos,
                          params["ln_g"], params["ln_b"])        # bf16 activations
    enc_b = enc_output.astype(jnp.bfloat16)                      # cast once, reused per layer
    slf_m = trg_mask.astype(jnp.int8)                            # (B, L, L)     compact mask
    crs_m = src_mask.astype(jnp.int8)                            # (B, 1, Lsrc)  natural shape
    for lp in params["layers"]:
        x = pallas_self_mha(x, slf_m, lp["slf"], n_head, d_k, d_v)           # self-attn
        x = pallas_cross_mha(x, enc_b, crs_m, lp["enc"], n_head, d_k, d_v)   # cross-attn
        x = pallas_ffn_ln(x, lp["ffn"])                                      # FFN
    return x.astype(jnp.float32)


# --------------------------- deterministic init ------------------------------ #

def init_params(key, n_trg_vocab, n_trg_dim, d_word_vec, d_model, d_inner,
                n_layers, n_head, d_k, d_v, pad_idx, n_position):
    def nrm(k, shape, scale=0.1):
        return jax.random.normal(k, shape, jnp.float32) * scale

    def nrm_bf16(k, shape, scale=0.1):
        return nrm(k, shape, scale).astype(jnp.bfloat16)         # MXU operands stored bf16

    Hdk, Hdv = n_head * d_k, n_head * d_v
    keys = jax.random.split(key, 4 + n_layers)
    emb = nrm(keys[0], (n_trg_vocab, d_word_vec))
    emb = emb.at[pad_idx].set(0.0)                               # padding_idx row zeroed
    params = {
        "emb_table": emb,
        "exp_w": nrm_bf16(keys[1], (n_trg_dim, d_word_vec)),
        "exp_b": nrm(keys[2], (1, d_word_vec)),
        "pos_table": sinusoid_table(n_position, d_word_vec),
        "ln_g": jnp.ones((1, d_model), jnp.float32),
        "ln_b": jnp.zeros((1, d_model), jnp.float32),
        "layers": [],
    }
    for li in range(n_layers):
        lk = jax.random.split(keys[4 + li], 10)
        layer = {
            "slf": {
                "wqkv": nrm_bf16(lk[0], (d_model, 2 * Hdk + Hdv)),   # fused Wq|Wk|Wv
                "wo": nrm_bf16(lk[1], (Hdv, d_model)),
                "ln_g": jnp.ones((1, d_model), jnp.float32),
                "ln_b": jnp.zeros((1, d_model), jnp.float32),
            },
            "enc": {
                "wq": nrm_bf16(lk[2], (d_model, Hdk)),
                "wkv": nrm_bf16(lk[3], (d_model, Hdk + Hdv)),        # fused Wk|Wv
                "wo": nrm_bf16(lk[4], (Hdv, d_model)),
                "ln_g": jnp.ones((1, d_model), jnp.float32),
                "ln_b": jnp.zeros((1, d_model), jnp.float32),
            },
            "ffn": {
                "w1": nrm_bf16(lk[5], (d_model, d_inner)),
                "b1": nrm(lk[6], (1, d_inner)),
                "w2": nrm_bf16(lk[7], (d_inner, d_model)),
                "b2": nrm(lk[8], (1, d_model)),
                "ln_g": jnp.ones((1, d_model), jnp.float32),
                "ln_b": jnp.zeros((1, d_model), jnp.float32),
            },
        }
        params["layers"].append(layer)
    return params


# ---------------------------------- main ------------------------------------- #

if __name__ == "__main__":
    # small shapes consistent with the module
    B, L, Lsrc = 2, 8, 8
    n_trg_vocab, n_trg_dim = 20, 56
    d_word_vec = d_model = 32
    d_inner = 64
    n_layers, n_head, d_k, d_v = 2, 2, 16, 16
    pad_idx, n_position = 0, 64

    root = jax.random.PRNGKey(0)
    kp, k1, k2, k3, k4 = jax.random.split(root, 5)

    params = init_params(kp, n_trg_vocab, n_trg_dim, d_word_vec, d_model, d_inner,
                         n_layers, n_head, d_k, d_v, pad_idx, n_position)

    trg_seq = jax.random.randint(k1, (B, L), 0, n_trg_vocab, dtype=jnp.int32)
    trg_exp = jax.random.normal(k2, (B, L, n_trg_dim), jnp.float32)
    exp_mask = jax.random.bernoulli(k3, 0.5, (B, L))
    enc_output = jax.random.normal(k4, (B, Lsrc, d_model), jnp.float32)
    # causal self-attention mask [B, L, L] and full source mask [B, 1, Lsrc]
    trg_mask = jnp.broadcast_to(jnp.tril(jnp.ones((L, L), jnp.float32)), (B, L, L))
    src_mask = jnp.ones((B, 1, Lsrc), jnp.float32)

    fwd = jax.jit(functools.partial(decoder_forward, n_head=n_head, d_k=d_k, d_v=d_v))
    out = fwd(params, trg_seq, trg_mask, trg_exp, exp_mask, enc_output, src_mask)
    jax.block_until_ready(out)
    assert out.shape == (B, L, d_model) and out.dtype == jnp.float32
    assert bool(jnp.isfinite(out).all())
    print("KERNEL_OK")
</pallas_src>

<mosaic_0001>
module attributes {stable_mosaic.version = 11 : i64} {
  func.func @_embed_kernel(%arg0: i32, %arg1: memref<1x8x32xf32, #tpu.memory_space<vmem>>, %arg2: memref<1x8x56xf32, #tpu.memory_space<vmem>>, %arg3: memref<1x8x1xf32, #tpu.memory_space<vmem>>, %arg4: memref<56x32xbf16, #tpu.memory_space<vmem>>, %arg5: memref<1x32xf32, #tpu.memory_space<vmem>>, %arg6: memref<8x32xf32, #tpu.memory_space<vmem>>, %arg7: memref<1x32xf32, #tpu.memory_space<vmem>>, %arg8: memref<1x32xf32, #tpu.memory_space<vmem>>, %arg9: memref<1x8x32xbf16, #tpu.memory_space<vmem>>) attributes {dimension_semantics = [#tpu.dimension_semantics<parallel>], iteration_bounds = array<i64: 2>, scalar_prefetch = 0 : i64, scratch_operands = 0 : i64, tpu.core_type = #tpu.core_type<tc>, window_params = [{transform_indices = @transform_0, window_bounds = array<i64: 1, 8, 32>}, {transform_indices = @transform_1, window_bounds = array<i64: 1, 8, 56>}, {transform_indices = @transform_2, window_bounds = array<i64: 1, 8, 1>}, {pipeline_mode = #tpu.pipeline_mode<synchronous>, transform_indices = @transform_3, window_bounds = array<i64: 56, 32>}, {pipeline_mode = #tpu.pipeline_mode<synchronous>, transform_indices = @transform_4, window_bounds = array<i64: 1, 32>}, {pipeline_mode = #tpu.pipeline_mode<synchronous>, transform_indices = @transform_5, window_bounds = array<i64: 8, 32>}, {pipeline_mode = #tpu.pipeline_mode<synchronous>, transform_indices = @transform_6, window_bounds = array<i64: 1, 32>}, {pipeline_mode = #tpu.pipeline_mode<synchronous>, transform_indices = @transform_7, window_bounds = array<i64: 1, 32>}, {transform_indices = @transform_8, window_bounds = array<i64: 1, 8, 32>}]} {
    %c0 = arith.constant 0 : index
    %c0_0 = arith.constant 0 : index
    %c0_1 = arith.constant 0 : index
    %0 = vector.load %arg1[%c0, %c0_0, %c0_1] : memref<1x8x32xf32, #tpu.memory_space<vmem>>, vector<1x8x32xf32>
    %1 = vector.shape_cast %0 : vector<1x8x32xf32> to vector<8x32xf32>
    %c0_2 = arith.constant 0 : index
    %c0_3 = arith.constant 0 : index
    %c0_4 = arith.constant 0 : index
    %2 = vector.load %arg2[%c0_2, %c0_3, %c0_4] : memref<1x8x56xf32, #tpu.memory_space<vmem>>, vector<1x8x56xf32>
    %3 = vector.shape_cast %2 : vector<1x8x56xf32> to vector<8x56xf32>
    %c0_5 = arith.constant 0 : index
    %c0_6 = arith.constant 0 : index
    %c0_7 = arith.constant 0 : index
    %4 = vector.load %arg3[%c0_5, %c0_6, %c0_7] : memref<1x8x1xf32, #tpu.memory_space<vmem>>, vector<1x8x1xf32>
    %5 = vector.shape_cast %4 : vector<1x8x1xf32> to vector<8x1xf32>
    %6 = arith.truncf %3 : vector<8x56xf32> to vector<8x56xbf16>
    %c0_8 = arith.constant 0 : index
    %c0_9 = arith.constant 0 : index
    %7 = vector.load %arg4[%c0_8, %c0_9] : memref<56x32xbf16, #tpu.memory_space<vmem>>, vector<56x32xbf16>
    %cst = arith.constant dense<0.000000e+00> : vector<8x32xf32>
    %8 = tpu.matmul %6, %7, %cst {dimension_numbers = #tpu.dot_dimension_numbers<[1], [0], [0], [1], [0, 0, 1, 1], [], []>} : vector<8x56xbf16>, vector<56x32xbf16>, vector<8x32xf32> -> vector<8x32xf32>
    %c0_10 = arith.constant 0 : index
    %c0_11 = arith.constant 0 : index
    %9 = vector.load %arg5[%c0_10, %c0_11] : memref<1x32xf32, #tpu.memory_space<vmem>>, vector<1x32xf32>
    %10 = vector.broadcast %9 : vector<1x32xf32> to vector<8x32xf32>
    %11 = arith.addf %8, %10 : vector<8x32xf32>
    %cst_12 = arith.constant 0.000000e+00 : f32
    %12 = vector.broadcast %cst_12 : f32 to vector<8x1xf32>
    %13 = arith.cmpf ogt, %5, %12 : vector<8x1xf32>
    %14 = vector.shape_cast %13 : vector<8x1xi1> to vector<8x1xi1>
    %15 = vector.broadcast %14 : vector<8x1xi1> to vector<8x32xi1>
    %16 = arith.select %15, %11, %1 : vector<8x32xi1>, vector<8x32xf32>
    %c0_13 = arith.constant 0 : index
    %c0_14 = arith.constant 0 : index
    %17 = vector.load %arg6[%c0_13, %c0_14] : memref<8x32xf32, #tpu.memory_space<vmem>>, vector<8x32xf32>
    %18 = arith.addf %16, %17 : vector<8x32xf32>
    %c0_15 = arith.constant 0 : index
    %c0_16 = arith.constant 0 : index
    %19 = vector.load %arg7[%c0_15, %c0_16] : memref<1x32xf32, #tpu.memory_space<vmem>>, vector<1x32xf32>
    %c0_17 = arith.constant 0 : index
    %c0_18 = arith.constant 0 : index
    %20 = vector.load %arg8[%c0_17, %c0_18] : memref<1x32xf32, #tpu.memory_space<vmem>>, vector<1x32xf32>
    %cst_19 = arith.constant dense<0.000000e+00> : vector<8xf32>
    %21 = vector.multi_reduction <add>, %18, %cst_19 [1] : vector<8x32xf32> to vector<8xf32>
    %22 = vector.shape_cast %21 : vector<8xf32> to vector<8x1xf32>
    %cst_20 = arith.constant 3.200000e+01 : f32
    %23 = vector.broadcast %cst_20 : f32 to vector<8x1xf32>
    %24 = arith.divf %22, %23 : vector<8x1xf32>
    %25 = vector.broadcast %24 : vector<8x1xf32> to vector<8x32xf32>
    %26 = arith.subf %18, %25 : vector<8x32xf32>
    %27 = arith.mulf %26, %26 : vector<8x32xf32>
    %cst_21 = arith.constant dense<0.000000e+00> : vector<8xf32>
    %28 = vector.multi_reduction <add>, %27, %cst_21 [1] : vector<8x32xf32> to vector<8xf32>
    %29 = vector.shape_cast %28 : vector<8xf32> to vector<8x1xf32>
    %cst_22 = arith.constant 3.200000e+01 : f32
    %30 = vector.broadcast %cst_22 : f32 to vector<8x1xf32>
    %31 = arith.divf %29, %30 : vector<8x1xf32>
    %32 = vector.broadcast %24 : vector<8x1xf32> to vector<8x32xf32>
    %33 = arith.subf %18, %32 : vector<8x32xf32>
    %cst_23 = arith.constant 9.99999997E-7 : f32
    %34 = vector.broadcast %cst_23 : f32 to vector<8x1xf32>
    %35 = arith.addf %31, %34 : vector<8x1xf32>
    %36 = math.rsqrt %35 : vector<8x1xf32>
    %37 = vector.broadcast %36 : vector<8x1xf32> to vector<8x32xf32>
    %38 = arith.mulf %33, %37 : vector<8x32xf32>
    %39 = vector.broadcast %19 : vector<1x32xf32> to vector<8x32xf32>
    %40 = arith.mulf %38, %39 : vector<8x32xf32>
    %41 = vector.broadcast %20 : vector<1x32xf32> to vector<8x32xf32>
    %42 = arith.addf %40, %41 : vector<8x32xf32>
    %43 = arith.truncf %42 : vector<8x32xf32> to vector<8x32xbf16>
    %c0_24 = arith.constant 0 : index
    %c0_25 = arith.constant 0 : index
    %c0_26 = arith.constant 0 : index
    %44 = vector.load %arg9[%c0_24, %c0_25, %c0_26] : memref<1x8x32xbf16, #tpu.memory_space<vmem>>, vector<1x8x32xbf16>
    %45 = vector.shape_cast %44 : vector<1x8x32xbf16> to vector<8x32xbf16>
    %46 = vector.shape_cast %43 : vector<8x32xbf16> to vector<1x8x32xbf16>
    tpu.vector_store %arg9[%c0_24, %c0_25, %c0_26], %46 {strides = array<i32>} : memref<1x8x32xbf16, #tpu.memory_space<vmem>>, vector<1x8x32xbf16>,
    return
  }
  func.func @transform_0(%arg0: i32) -> (i32, i32, i32) {
    %c0_i32 = arith.constant 0 : i32
    %c0_i32_0 = arith.constant 0 : i32
    %c0_i32_1 = arith.constant 0 : i32
    return %arg0, %c0_i32, %c0_i32_0 : i32, i32, i32
  }
  func.func @transform_1(%arg0: i32) -> (i32, i32, i32) {
    %c0_i32 = arith.constant 0 : i32
    %c0_i32_0 = arith.constant 0 : i32
    %c0_i32_1 = arith.constant 0 : i32
    return %arg0, %c0_i32, %c0_i32_0 : i32, i32, i32
  }
  func.func @transform_2(%arg0: i32) -> (i32, i32, i32) {
    %c0_i32 = arith.constant 0 : i32
    %c0_i32_0 = arith.constant 0 : i32
    %c0_i32_1 = arith.constant 0 : i32
    return %arg0, %c0_i32, %c0_i32_0 : i32, i32, i32
  }
  func.func @transform_3(%arg0: i32) -> (i32, i32) {
    %c0_i32 = arith.constant 0 : i32
    %c0_i32_0 = arith.constant 0 : i32
    %c0_i32_1 = arith.constant 0 : i32
    return %c0_i32, %c0_i32_0 : i32, i32
  }
  func.func @transform_4(%arg0: i32) -> (i32, i32) {
    %c0_i32 = arith.constant 0 : i32
    %c0_i32_0 = arith.constant 0 : i32
    %c0_i32_1 = arith.constant 0 : i32
    return %c0_i32, %c0_i32_0 : i32, i32
  }
  func.func @transform_5(%arg0: i32) -> (i32, i32) {
    %c0_i32 = arith.constant 0 : i32
    %c0_i32_0 = arith.constant 0 : i32
    %c0_i32_1 = arith.constant 0 : i32
    return %c0_i32, %c0_i32_0 : i32, i32
  }
  func.func @transform_6(%arg0: i32) -> (i32, i32) {
    %c0_i32 = arith.constant 0 : i32
    %c0_i32_0 = arith.constant 0 : i32
    %c0_i32_1 = arith.constant 0 : i32
    return %c0_i32, %c0_i32_0 : i32, i32
  }
  func.func @transform_7(%arg0: i32) -> (i32, i32) {
    %c0_i32 = arith.constant 0 : i32
    %c0_i32_0 = arith.constant 0 : i32
    %c0_i32_1 = arith.constant 0 : i32
    return %c0_i32, %c0_i32_0 : i32, i32
  }
  func.func @transform_8(%arg0: i32) -> (i32, i32, i32) {
    %c0_i32 = arith.constant 0 : i32
    %c0_i32_0 = arith.constant 0 : i32
    %c0_i32_1 = arith.constant 0 : i32
    return %arg0, %c0_i32, %c0_i32_0 : i32, i32, i32
  }
}

module attributes {stable_mosaic.version = 11 : i64} {
  func.func @_self_mha_kernel(%arg0: i32, %arg1: memref<1x8x32xbf16, #tpu.memory_space<vmem>>, %arg2: memref<1x8x8xi8, #tpu.memory_space<vmem>>, %arg3: memref<32x96xbf16, #tpu.memory_space<vmem>>, %arg4: memref<32x32xbf16, #tpu.memory_space<vmem>>, %arg5: memref<1x32xf32, #tpu.memory_space<vmem>>, %arg6: memref<1x32xf32, #tpu.memory_space<vmem>>, %arg7: memref<1x8x32xbf16, #tpu.memory_space<vmem>>, %arg8: memref<8x32xbf16, #tpu.memory_space<vmem>>) attributes {dimension_semantics = [#tpu.dimension_semantics<parallel>], iteration_bounds = array<i64: 2>, scalar_prefetch = 0 : i64, scratch_operands = 1 : i64, tpu.core_type = #tpu.core_type<tc>, window_params = [{transform_indices = @transform_0, window_bounds = array<i64: 1, 8, 32>}, {transform_indices = @transform_1, window_bounds = array<i64: 1, 8, 8>}, {pipeline_mode = #tpu.pipeline_mode<synchronous>, transform_indices = @transform_2, window_bounds = array<i64: 32, 96>}, {pipeline_mode = #tpu.pipeline_mode<synchronous>, transform_indices = @transform_3, window_bounds = array<i64: 32, 32>}, {pipeline_mode = #tpu.pipeline_mode<synchronous>, transform_indices = @transform_4, window_bounds = array<i64: 1, 32>}, {pipeline_mode = #tpu.pipeline_mode<synchronous>, transform_indices = @transform_5, window_bounds = array<i64: 1, 32>}, {transform_indices = @transform_6, window_bounds = array<i64: 1, 8, 32>}]} {
    %c0 = arith.constant 0 : index
    %c0_0 = arith.constant 0 : index
    %c0_1 = arith.constant 0 : index
    %0 = vector.load %arg1[%c0, %c0_0, %c0_1] : memref<1x8x32xbf16, #tpu.memory_space<vmem>>, vector<1x8x32xbf16>
    %1 = vector.shape_cast %0 : vector<1x8x32xbf16> to vector<8x32xbf16>
    %c0_2 = arith.constant 0 : index
    %c0_3 = arith.constant 0 : index
    %2 = vector.load %arg3[%c0_2, %c0_3] : memref<32x96xbf16, #tpu.memory_space<vmem>>, vector<32x96xbf16>
    %cst = arith.constant dense<0.000000e+00> : vector<8x96xf32>
    %3 = tpu.matmul %1, %2, %cst {dimension_numbers = #tpu.dot_dimension_numbers<[1], [0], [0], [1], [0, 0, 1, 1], [], []>} : vector<8x32xbf16>, vector<32x96xbf16>, vector<8x96xf32> -> vector<8x96xf32>
    %4 = arith.truncf %3 : vector<8x96xf32> to vector<8x96xbf16>
    %5 = vector.extract_strided_slice %4 {offsets = [0, 0], sizes = [8, 32], strides = [1, 1]} : vector<8x96xbf16> to vector<8x32xbf16>
    %6 = vector.extract_strided_slice %4 {offsets = [0, 32], sizes = [8, 32], strides = [1, 1]} : vector<8x96xbf16> to vector<8x32xbf16>
    %7 = vector.extract_strided_slice %4 {offsets = [0, 64], sizes = [8, 32], strides = [1, 1]} : vector<8x96xbf16> to vector<8x32xbf16>
    %c0_4 = arith.constant 0 : index
    %c0_5 = arith.constant 0 : index
    %c0_6 = arith.constant 0 : index
    %8 = vector.load %arg2[%c0_4, %c0_5, %c0_6] : memref<1x8x8xi8, #tpu.memory_space<vmem>>, vector<1x8x8xi8>
    %9 = vector.shape_cast %8 : vector<1x8x8xi8> to vector<8x8xi8>
    %c0_i8 = arith.constant 0 : i8
    %10 = vector.broadcast %c0_i8 : i8 to vector<8x8xi8>
    %11 = arith.cmpi ne, %9, %10 : vector<8x8xi8>
    %12 = vector.extract_strided_slice %5 {offsets = [0, 0], sizes = [8, 16], strides = [1, 1]} : vector<8x32xbf16> to vector<8x16xbf16>
    %13 = vector.extract_strided_slice %6 {offsets = [0, 0], sizes = [8, 16], strides = [1, 1]} : vector<8x32xbf16> to vector<8x16xbf16>
    %14 = vector.extract_strided_slice %7 {offsets = [0, 0], sizes = [8, 16], strides = [1, 1]} : vector<8x32xbf16> to vector<8x16xbf16>
    %cst_7 = arith.constant dense<0.000000e+00> : vector<8x8xf32>
    %15 = tpu.matmul %12, %13, %cst_7 {dimension_numbers = #tpu.dot_dimension_numbers<[1], [1], [0], [0], [0, 0, 1, 0], [], []>} : vector<8x16xbf16>, vector<8x16xbf16>, vector<8x8xf32> -> vector<8x8xf32>
    %cst_8 = arith.constant 2.500000e-01 : f32
    %16 = vector.broadcast %cst_8 : f32 to vector<8x8xf32>
    %17 = arith.mulf %15, %16 : vector<8x8xf32>
    %cst_9 = arith.constant -1.000000e+09 : f32
    %18 = vector.broadcast %cst_9 : f32 to vector<8x8xf32>
    %19 = arith.select %11, %17, %18 : vector<8x8xi1>, vector<8x8xf32>
    %cst_10 = arith.constant dense<0xFF800000> : vector<8xf32>
    %20 = vector.multi_reduction <maximumf>, %19, %cst_10 [1] : vector<8x8xf32> to vector<8xf32>
    %21 = vector.shape_cast %20 : vector<8xf32> to vector<8x1xf32>
    %22 = vector.broadcast %21 : vector<8x1xf32> to vector<8x8xf32>
    %23 = arith.subf %19, %22 : vector<8x8xf32>
    %24 = math.exp %23 : vector<8x8xf32>
    %cst_11 = arith.constant dense<0.000000e+00> : vector<8xf32>
    %25 = vector.multi_reduction <add>, %24, %cst_11 [1] : vector<8x8xf32> to vector<8xf32>
    %26 = vector.shape_cast %25 : vector<8xf32> to vector<8x1xf32>
    %27 = tpu.reciprocal %26 {approx = true} : vector<8x1xf32> -> vector<8x1xf32>
    %28 = vector.broadcast %27 : vector<8x1xf32> to vector<8x8xf32>
    %29 = arith.mulf %24, %28 : vector<8x8xf32>
    %30 = arith.truncf %29 : vector<8x8xf32> to vector<8x8xbf16>
    %cst_12 = arith.constant dense<0.000000e+00> : vector<8x16xf32>
    %31 = tpu.matmul %30, %14, %cst_12 {dimension_numbers = #tpu.dot_dimension_numbers<[1], [0], [0], [1], [0, 0, 1, 1], [], []>} : vector<8x8xbf16>, vector<8x16xbf16>, vector<8x16xf32> -> vector<8x16xf32>
    %32 = arith.truncf %31 : vector<8x16xf32> to vector<8x16xbf16>
    %c0_13 = arith.constant 0 : index
    %c0_14 = arith.constant 0 : index
    %33 = vector.load %arg8[%c0_13, %c0_14] : memref<8x32xbf16, #tpu.memory_space<vmem>>, vector<8x16xbf16>
    tpu.vector_store %arg8[%c0_13, %c0_14], %32 {strides = array<i32>} : memref<8x32xbf16, #tpu.memory_space<vmem>>, vector<8x16xbf16>,
    %34 = vector.extract_strided_slice %5 {offsets = [0, 16], sizes = [8, 16], strides = [1, 1]} : vector<8x32xbf16> to vector<8x16xbf16>
    %35 = vector.extract_strided_slice %6 {offsets = [0, 16], sizes = [8, 16], strides = [1, 1]} : vector<8x32xbf16> to vector<8x16xbf16>
    %36 = vector.extract_strided_slice %7 {offsets = [0, 16], sizes = [8, 16], strides = [1, 1]} : vector<8x32xbf16> to vector<8x16xbf16>
    %cst_15 = arith.constant dense<0.000000e+00> : vector<8x8xf32>
    %37 = tpu.matmul %34, %35, %cst_15 {dimension_numbers = #tpu.dot_dimension_numbers<[1], [1], [0], [0], [0, 0, 1, 0], [], []>} : vector<8x16xbf16>, vector<8x16xbf16>, vector<8x8xf32> -> vector<8x8xf32>
    %cst_16 = arith.constant 2.500000e-01 : f32
    %38 = vector.broadcast %cst_16 : f32 to vector<8x8xf32>
    %39 = arith.mulf %37, %38 : vector<8x8xf32>
    %cst_17 = arith.constant -1.000000e+09 : f32
    %40 = vector.broadcast %cst_17 : f32 to vector<8x8xf32>
    %41 = arith.select %11, %39, %40 : vector<8x8xi1>, vector<8x8xf32>
    %cst_18 = arith.constant dense<0xFF800000> : vector<8xf32>
    %42 = vector.multi_reduction <maximumf>, %41, %cst_18 [1] : vector<8x8xf32> to vector<8xf32>
    %43 = vector.shape_cast %42 : vector<8xf32> to vector<8x1xf32>
    %44 = vector.broadcast %43 : vector<8x1xf32> to vector<8x8xf32>
    %45 = arith.subf %41, %44 : vector<8x8xf32>
    %46 = math.exp %45 : vector<8x8xf32>
    %cst_19 = arith.constant dense<0.000000e+00> : vector<8xf32>
    %47 = vector.multi_reduction <add>, %46, %cst_19 [1] : vector<8x8xf32> to vector<8xf32>
    %48 = vector.shape_cast %47 : vector<8xf32> to vector<8x1xf32>
    %49 = tpu.reciprocal %48 {approx = true} : vector<8x1xf32> -> vector<8x1xf32>
    %50 = vector.broadcast %49 : vector<8x1xf32> to vector<8x8xf32>
    %51 = arith.mulf %46, %50 : vector<8x8xf32>
    %52 = arith.truncf %51 : vector<8x8xf32> to vector<8x8xbf16>
    %cst_20 = arith.constant dense<0.000000e+00> : vector<8x16xf32>
    %53 = tpu.matmul %52, %36, %cst_20 {dimension_numbers = #tpu.dot_dimension_numbers<[1], [0], [0], [1], [0, 0, 1, 1], [], []>} : vector<8x8xbf16>, vector<8x16xbf16>, vector<8x16xf32> -> vector<8x16xf32>
    %54 = arith.truncf %53 : vector<8x16xf32> to vector<8x16xbf16>
    %c0_21 = arith.constant 0 : index
    %c16 = arith.constant 16 : index
    %55 = vector.load %arg8[%c0_21, %c16] : memref<8x32xbf16, #tpu.memory_space<vmem>>, vector<8x16xbf16>
    tpu.vector_store %arg8[%c0_21, %c16], %54 {strides = array<i32>} : memref<8x32xbf16, #tpu.memory_space<vmem>>, vector<8x16xbf16>,
    %c0_22 = arith.constant 0 : index
    %c0_23 = arith.constant 0 : index
    %56 = vector.load %arg8[%c0_22, %c0_23] : memref<8x32xbf16, #tpu.memory_space<vmem>>, vector<8x32xbf16>
    %c0_24 = arith.constant 0 : index
    %c0_25 = arith.constant 0 : index
    %57 = vector.load %arg4[%c0_24, %c0_25] : memref<32x32xbf16, #tpu.memory_space<vmem>>, vector<32x32xbf16>
    %cst_26 = arith.constant dense<0.000000e+00> : vector<8x32xf32>
    %58 = tpu.matmul %56, %57, %cst_26 {dimension_numbers = #tpu.dot_dimension_numbers<[1], [0], [0], [1], [0, 0, 1, 1], [], []>} : vector<8x32xbf16>, vector<32x32xbf16>, vector<8x32xf32> -> vector<8x32xf32>
    %59 = arith.extf %1 : vector<8x32xbf16> to vector<8x32xf32>
    %60 = arith.addf %58, %59 : vector<8x32xf32>
    %c0_27 = arith.constant 0 : index
    %c0_28 = arith.constant 0 : index
    %61 = vector.load %arg5[%c0_27, %c0_28] : memref<1x32xf32, #tpu.memory_space<vmem>>, vector<1x32xf32>
    %c0_29 = arith.constant 0 : index
    %c0_30 = arith.constant 0 : index
    %62 = vector.load %arg6[%c0_29, %c0_30] : memref<1x32xf32, #tpu.memory_space<vmem>>, vector<1x32xf32>
    %cst_31 = arith.constant dense<0.000000e+00> : vector<8xf32>
    %63 = vector.multi_reduction <add>, %60, %cst_31 [1] : vector<8x32xf32> to vector<8xf32>
    %64 = vector.shape_cast %63 : vector<8xf32> to vector<8x1xf32>
    %cst_32 = arith.constant 3.200000e+01 : f32
    %65 = vector.broadcast %cst_32 : f32 to vector<8x1xf32>
    %66 = arith.divf %64, %65 : vector<8x1xf32>
    %67 = vector.broadcast %66 : vector<8x1xf32> to vector<8x32xf32>
    %68 = arith.subf %60, %67 : vector<8x32xf32>
    %69 = arith.mulf %68, %68 : vector<8x32xf32>
    %cst_33 = arith.constant dense<0.000000e+00> : vector<8xf32>
    %70 = vector.multi_reduction <add>, %69, %cst_33 [1] : vector<8x32xf32> to vector<8xf32>
    %71 = vector.shape_cast %70 : vector<8xf32> to vector<8x1xf32>
    %cst_34 = arith.constant 3.200000e+01 : f32
    %72 = vector.broadcast %cst_34 : f32 to vector<8x1xf32>
    %73 = arith.divf %71, %72 : vector<8x1xf32>
    %74 = vector.broadcast %66 : vector<8x1xf32> to vector<8x32xf32>
    %75 = arith.subf %60, %74 : vector<8x32xf32>
    %cst_35 = arith.constant 9.99999997E-7 : f32
    %76 = vector.broadcast %cst_35 : f32 to vector<8x1xf32>
    %77 = arith.addf %73, %76 : vector<8x1xf32>
    %78 = math.rsqrt %77 : vector<8x1xf32>
    %79 = vector.broadcast %78 : vector<8x1xf32> to vector<8x32xf32>
    %80 = arith.mulf %75, %79 : vector<8x32xf32>
    %81 = vector.broadcast %61 : vector<1x32xf32> to vector<8x32xf32>
    %82 = arith.mulf %80, %81 : vector<8x32xf32>
    %83 = vector.broadcast %62 : vector<1x32xf32> to vector<8x32xf32>
    %84 = arith.addf %82, %83 : vector<8x32xf32>
    %85 = arith.truncf %84 : vector<8x32xf32> to vector<8x32xbf16>
    %c0_36 = arith.constant 0 : index
    %c0_37 = arith.constant 0 : index
    %c0_38 = arith.constant 0 : index
    %86 = vector.load %arg7[%c0_36, %c0_37, %c0_38] : memref<1x8x32xbf16, #tpu.memory_space<vmem>>, vector<1x8x32xbf16>
    %87 = vector.shape_cast %86 : vector<1x8x32xbf16> to vector<8x32xbf16>
    %88 = vector.shape_cast %85 : vector<8x32xbf16> to vector<1x8x32xbf16>
    tpu.vector_store %arg7[%c0_36, %c0_37, %c0_38], %88 {strides = array<i32>} : memref<1x8x32xbf16, #tpu.memory_space<vmem>>, vector<1x8x32xbf16>,
    return
  }
  func.func @transform_0(%arg0: i32) -> (i32, i32, i32) {
    %c0_i32 = arith.constant 0 : i32
    %c0_i32_0 = arith.constant 0 : i32
    %c0_i32_1 = arith.constant 0 : i32
    return %arg0, %c0_i32, %c0_i32_0 : i32, i32, i32
  }
  func.func @transform_1(%arg0: i32) -> (i32, i32, i32) {
    %c0_i32 = arith.constant 0 : i32
    %c0_i32_0 = arith.constant 0 : i32
    %c0_i32_1 = arith.constant 0 : i32
    return %arg0, %c0_i32, %c0_i32_0 : i32, i32, i32
  }
  func.func @transform_2(%arg0: i32) -> (i32, i32) {
    %c0_i32 = arith.constant 0 : i32
    %c0_i32_0 = arith.constant 0 : i32
    %c0_i32_1 = arith.constant 0 : i32
    return %c0_i32, %c0_i32_0 : i32, i32
  }
  func.func @transform_3(%arg0: i32) -> (i32, i32) {
    %c0_i32 = arith.constant 0 : i32
    %c0_i32_0 = arith.constant 0 : i32
    %c0_i32_1 = arith.constant 0 : i32
    return %c0_i32, %c0_i32_0 : i32, i32
  }
  func.func @transform_4(%arg0: i32) -> (i32, i32) {
    %c0_i32 = arith.constant 0 : i32
    %c0_i32_0 = arith.constant 0 : i32
    %c0_i32_1 = arith.constant 0 : i32
    return %c0_i32, %c0_i32_0 : i32, i32
  }
  func.func @transform_5(%arg0: i32) -> (i32, i32) {
    %c0_i32 = arith.constant 0 : i32
    %c0_i32_0 = arith.constant 0 : i32
    %c0_i32_1 = arith.constant 0 : i32
    return %c0_i32, %c0_i32_0 : i32, i32
  }
  func.func @transform_6(%arg0: i32) -> (i32, i32, i32) {
    %c0_i32 = arith.constant 0 : i32
    %c0_i32_0 = arith.constant 0 : i32
    %c0_i32_1 = arith.constant 0 : i32
    return %arg0, %c0_i32, %c0_i32_0 : i32, i32, i32
  }
}

module attributes {stable_mosaic.version = 11 : i64} {
  func.func @_cross_mha_kernel(%arg0: i32, %arg1: i32, %arg2: memref<1x8x32xbf16, #tpu.memory_space<vmem>>, %arg3: memref<1x8x32xbf16, #tpu.memory_space<vmem>>, %arg4: memref<1x1x8xi8, #tpu.memory_space<vmem>>, %arg5: memref<32x32xbf16, #tpu.memory_space<vmem>>, %arg6: memref<32x64xbf16, #tpu.memory_space<vmem>>, %arg7: memref<32x32xbf16, #tpu.memory_space<vmem>>, %arg8: memref<1x32xf32, #tpu.memory_space<vmem>>, %arg9: memref<1x32xf32, #tpu.memory_space<vmem>>, %arg10: memref<1x8x32xbf16, #tpu.memory_space<vmem>>, %arg11: memref<8x32xbf16, #tpu.memory_space<vmem>>) attributes {dimension_semantics = [#tpu.dimension_semantics<parallel>, #tpu.dimension_semantics<parallel>], iteration_bounds = array<i64: 2, 1>, scalar_prefetch = 0 : i64, scratch_operands = 1 : i64, tpu.core_type = #tpu.core_type<tc>, window_params = [{transform_indices = @transform_0, window_bounds = array<i64: 1, 8, 32>}, {transform_indices = @transform_1, window_bounds = array<i64: 1, 8, 32>}, {transform_indices = @transform_2, window_bounds = array<i64: 1, 1, 8>}, {pipeline_mode = #tpu.pipeline_mode<synchronous>, transform_indices = @transform_3, window_bounds = array<i64: 32, 32>}, {pipeline_mode = #tpu.pipeline_mode<synchronous>, transform_indices = @transform_4, window_bounds = array<i64: 32, 64>}, {pipeline_mode = #tpu.pipeline_mode<synchronous>, transform_indices = @transform_5, window_bounds = array<i64: 32, 32>}, {pipeline_mode = #tpu.pipeline_mode<synchronous>, transform_indices = @transform_6, window_bounds = array<i64: 1, 32>}, {pipeline_mode = #tpu.pipeline_mode<synchronous>, transform_indices = @transform_7, window_bounds = array<i64: 1, 32>}, {transform_indices = @transform_8, window_bounds = array<i64: 1, 8, 32>}]} {
    %c0 = arith.constant 0 : index
    %c0_0 = arith.constant 0 : index
    %c0_1 = arith.constant 0 : index
    %0 = vector.load %arg2[%c0, %c0_0, %c0_1] : memref<1x8x32xbf16, #tpu.memory_space<vmem>>, vector<1x8x32xbf16>
    %1 = vector.shape_cast %0 : vector<1x8x32xbf16> to vector<8x32xbf16>
    %c0_2 = arith.constant 0 : index
    %c0_3 = arith.constant 0 : index
    %c0_4 = arith.constant 0 : index
    %2 = vector.load %arg3[%c0_2, %c0_3, %c0_4] : memref<1x8x32xbf16, #tpu.memory_space<vmem>>, vector<1x8x32xbf16>
    %3 = vector.shape_cast %2 : vector<1x8x32xbf16> to vector<8x32xbf16>
    %c0_5 = arith.constant 0 : index
    %c0_6 = arith.constant 0 : index
    %4 = vector.load %arg5[%c0_5, %c0_6] : memref<32x32xbf16, #tpu.memory_space<vmem>>, vector<32x32xbf16>
    %cst = arith.constant dense<0.000000e+00> : vector<8x32xf32>
    %5 = tpu.matmul %1, %4, %cst {dimension_numbers = #tpu.dot_dimension_numbers<[1], [0], [0], [1], [0, 0, 1, 1], [], []>} : vector<8x32xbf16>, vector<32x32xbf16>, vector<8x32xf32> -> vector<8x32xf32>
    %6 = arith.truncf %5 : vector<8x32xf32> to vector<8x32xbf16>
    %c0_7 = arith.constant 0 : index
    %c0_8 = arith.constant 0 : index
    %7 = vector.load %arg6[%c0_7, %c0_8] : memref<32x64xbf16, #tpu.memory_space<vmem>>, vector<32x64xbf16>
    %cst_9 = arith.constant dense<0.000000e+00> : vector<8x64xf32>
    %8 = tpu.matmul %3, %7, %cst_9 {dimension_numbers = #tpu.dot_dimension_numbers<[1], [0], [0], [1], [0, 0, 1, 1], [], []>} : vector<8x32xbf16>, vector<32x64xbf16>, vector<8x64xf32> -> vector<8x64xf32>
    %9 = arith.truncf %8 : vector<8x64xf32> to vector<8x64xbf16>
    %10 = vector.extract_strided_slice %9 {offsets = [0, 0], sizes = [8, 32], strides = [1, 1]} : vector<8x64xbf16> to vector<8x32xbf16>
    %11 = vector.extract_strided_slice %9 {offsets = [0, 32], sizes = [8, 32], strides = [1, 1]} : vector<8x64xbf16> to vector<8x32xbf16>
    %c0_10 = arith.constant 0 : index
    %c0_11 = arith.constant 0 : index
    %c0_12 = arith.constant 0 : index
    %12 = vector.load %arg4[%c0_10, %c0_11, %c0_12] : memref<1x1x8xi8, #tpu.memory_space<vmem>>, vector<1x1x8xi8>
    %13 = vector.shape_cast %12 : vector<1x1x8xi8> to vector<1x8xi8>
    %c0_i8 = arith.constant 0 : i8
    %14 = vector.broadcast %c0_i8 : i8 to vector<1x8xi8>
    %15 = arith.cmpi ne, %13, %14 : vector<1x8xi8>
    %16 = vector.extract_strided_slice %6 {offsets = [0, 0], sizes = [8, 16], strides = [1, 1]} : vector<8x32xbf16> to vector<8x16xbf16>
    %17 = vector.extract_strided_slice %10 {offsets = [0, 0], sizes = [8, 16], strides = [1, 1]} : vector<8x32xbf16> to vector<8x16xbf16>
    %18 = vector.extract_strided_slice %11 {offsets = [0, 0], sizes = [8, 16], strides = [1, 1]} : vector<8x32xbf16> to vector<8x16xbf16>
    %cst_13 = arith.constant dense<0.000000e+00> : vector<8x8xf32>
    %19 = tpu.matmul %16, %17, %cst_13 {dimension_numbers = #tpu.dot_dimension_numbers<[1], [1], [0], [0], [0, 0, 1, 0], [], []>} : vector<8x16xbf16>, vector<8x16xbf16>, vector<8x8xf32> -> vector<8x8xf32>
    %cst_14 = arith.constant 2.500000e-01 : f32
    %20 = vector.broadcast %cst_14 : f32 to vector<8x8xf32>
    %21 = arith.mulf %19, %20 : vector<8x8xf32>
    %cst_15 = arith.constant -1.000000e+09 : f32
    %22 = vector.shape_cast %15 : vector<1x8xi1> to vector<1x8xi1>
    %23 = vector.broadcast %22 : vector<1x8xi1> to vector<8x8xi1>
    %24 = vector.broadcast %cst_15 : f32 to vector<8x8xf32>
    %25 = arith.select %23, %21, %24 : vector<8x8xi1>, vector<8x8xf32>
    %cst_16 = arith.constant dense<0xFF800000> : vector<8xf32>
    %26 = vector.multi_reduction <maximumf>, %25, %cst_16 [1] : vector<8x8xf32> to vector<8xf32>
    %27 = vector.shape_cast %26 : vector<8xf32> to vector<8x1xf32>
    %28 = vector.broadcast %27 : vector<8x1xf32> to vector<8x8xf32>
    %29 = arith.subf %25, %28 : vector<8x8xf32>
    %30 = math.exp %29 : vector<8x8xf32>
    %cst_17 = arith.constant dense<0.000000e+00> : vector<8xf32>
    %31 = vector.multi_reduction <add>, %30, %cst_17 [1] : vector<8x8xf32> to vector<8xf32>
    %32 = vector.shape_cast %31 : vector<8xf32> to vector<8x1xf32>
    %33 = tpu.reciprocal %32 {approx = true} : vector<8x1xf32> -> vector<8x1xf32>
    %34 = vector.broadcast %33 : vector<8x1xf32> to vector<8x8xf32>
    %35 = arith.mulf %30, %34 : vector<8x8xf32>
    %36 = arith.truncf %35 : vector<8x8xf32> to vector<8x8xbf16>
    %cst_18 = arith.constant dense<0.000000e+00> : vector<8x16xf32>
    %37 = tpu.matmul %36, %18, %cst_18 {dimension_numbers = #tpu.dot_dimension_numbers<[1], [0], [0], [1], [0, 0, 1, 1], [], []>} : vector<8x8xbf16>, vector<8x16xbf16>, vector<8x16xf32> -> vector<8x16xf32>
    %38 = arith.truncf %37 : vector<8x16xf32> to vector<8x16xbf16>
    %c0_19 = arith.constant 0 : index
    %c0_20 = arith.constant 0 : index
    %39 = vector.load %arg11[%c0_19, %c0_20] : memref<8x32xbf16, #tpu.memory_space<vmem>>, vector<8x16xbf16>
    tpu.vector_store %arg11[%c0_19, %c0_20], %38 {strides = array<i32>} : memref<8x32xbf16, #tpu.memory_space<vmem>>, vector<8x16xbf16>,
    %40 = vector.extract_strided_slice %6 {offsets = [0, 16], sizes = [8, 16], strides = [1, 1]} : vector<8x32xbf16> to vector<8x16xbf16>
    %41 = vector.extract_strided_slice %10 {offsets = [0, 16], sizes = [8, 16], strides = [1, 1]} : vector<8x32xbf16> to vector<8x16xbf16>
    %42 = vector.extract_strided_slice %11 {offsets = [0, 16], sizes = [8, 16], strides = [1, 1]} : vector<8x32xbf16> to vector<8x16xbf16>
    %cst_21 = arith.constant dense<0.000000e+00> : vector<8x8xf32>
    %43 = tpu.matmul %40, %41, %cst_21 {dimension_numbers = #tpu.dot_dimension_numbers<[1], [1], [0], [0], [0, 0, 1, 0], [], []>} : vector<8x16xbf16>, vector<8x16xbf16>, vector<8x8xf32> -> vector<8x8xf32>
    %cst_22 = arith.constant 2.500000e-01 : f32
    %44 = vector.broadcast %cst_22 : f32 to vector<8x8xf32>
    %45 = arith.mulf %43, %44 : vector<8x8xf32>
    %cst_23 = arith.constant -1.000000e+09 : f32
    %46 = vector.shape_cast %15 : vector<1x8xi1> to vector<1x8xi1>
    %47 = vector.broadcast %46 : vector<1x8xi1> to vector<8x8xi1>
    %48 = vector.broadcast %cst_23 : f32 to vector<8x8xf32>
    %49 = arith.select %47, %45, %48 : vector<8x8xi1>, vector<8x8xf32>
    %cst_24 = arith.constant dense<0xFF800000> : vector<8xf32>
    %50 = vector.multi_reduction <maximumf>, %49, %cst_24 [1] : vector<8x8xf32> to vector<8xf32>
    %51 = vector.shape_cast %50 : vector<8xf32> to vector<8x1xf32>
    %52 = vector.broadcast %51 : vector<8x1xf32> to vector<8x8xf32>
    %53 = arith.subf %49, %52 : vector<8x8xf32>
    %54 = math.exp %53 : vector<8x8xf32>
    %cst_25 = arith.constant dense<0.000000e+00> : vector<8xf32>
    %55 = vector.multi_reduction <add>, %54, %cst_25 [1] : vector<8x8xf32> to vector<8xf32>
    %56 = vector.shape_cast %55 : vector<8xf32> to vector<8x1xf32>
    %57 = tpu.reciprocal %56 {approx = true} : vector<8x1xf32> -> vector<8x1xf32>
    %58 = vector.broadcast %57 : vector<8x1xf32> to vector<8x8xf32>
    %59 = arith.mulf %54, %58 : vector<8x8xf32>
    %60 = arith.truncf %59 : vector<8x8xf32> to vector<8x8xbf16>
    %cst_26 = arith.constant dense<0.000000e+00> : vector<8x16xf32>
    %61 = tpu.matmul %60, %42, %cst_26 {dimension_numbers = #tpu.dot_dimension_numbers<[1], [0], [0], [1], [0, 0, 1, 1], [], []>} : vector<8x8xbf16>, vector<8x16xbf16>, vector<8x16xf32> -> vector<8x16xf32>
    %62 = arith.truncf %61 : vector<8x16xf32> to vector<8x16xbf16>
    %c0_27 = arith.constant 0 : index
    %c16 = arith.constant 16 : index
    %63 = vector.load %arg11[%c0_27, %c16] : memref<8x32xbf16, #tpu.memory_space<vmem>>, vector<8x16xbf16>
    tpu.vector_store %arg11[%c0_27, %c16], %62 {strides = array<i32>} : memref<8x32xbf16, #tpu.memory_space<vmem>>, vector<8x16xbf16>,
    %c0_28 = arith.constant 0 : index
    %c0_29 = arith.constant 0 : index
    %64 = vector.load %arg11[%c0_28, %c0_29] : memref<8x32xbf16, #tpu.memory_space<vmem>>, vector<8x32xbf16>
    %c0_30 = arith.constant 0 : index
    %c0_31 = arith.constant 0 : index
    %65 = vector.load %arg7[%c0_30, %c0_31] : memref<32x32xbf16, #tpu.memory_space<vmem>>, vector<32x32xbf16>
    %cst_32 = arith.constant dense<0.000000e+00> : vector<8x32xf32>
    %66 = tpu.matmul %64, %65, %cst_32 {dimension_numbers = #tpu.dot_dimension_numbers<[1], [0], [0], [1], [0, 0, 1, 1], [], []>} : vector<8x32xbf16>, vector<32x32xbf16>, vector<8x32xf32> -> vector<8x32xf32>
    %67 = arith.extf %1 : vector<8x32xbf16> to vector<8x32xf32>
    %68 = arith.addf %66, %67 : vector<8x32xf32>
    %c0_33 = arith.constant 0 : index
    %c0_34 = arith.constant 0 : index
    %69 = vector.load %arg8[%c0_33, %c0_34] : memref<1x32xf32, #tpu.memory_space<vmem>>, vector<1x32xf32>
    %c0_35 = arith.constant 0 : index
    %c0_36 = arith.constant 0 : index
    %70 = vector.load %arg9[%c0_35, %c0_36] : memref<1x32xf32, #tpu.memory_space<vmem>>, vector<1x32xf32>
    %cst_37 = arith.constant dense<0.000000e+00> : vector<8xf32>
    %71 = vector.multi_reduction <add>, %68, %cst_37 [1] : vector<8x32xf32> to vector<8xf32>
    %72 = vector.shape_cast %71 : vector<8xf32> to vector<8x1xf32>
    %cst_38 = arith.constant 3.200000e+01 : f32
    %73 = vector.broadcast %cst_38 : f32 to vector<8x1xf32>
    %74 = arith.divf %72, %73 : vector<8x1xf32>
    %75 = vector.broadcast %74 : vector<8x1xf32> to vector<8x32xf32>
    %76 = arith.subf %68, %75 : vector<8x32xf32>
    %77 = arith.mulf %76, %76 : vector<8x32xf32>
    %cst_39 = arith.constant dense<0.000000e+00> : vector<8xf32>
    %78 = vector.multi_reduction <add>, %77, %cst_39 [1] : vector<8x32xf32> to vector<8xf32>
    %79 = vector.shape_cast %78 : vector<8xf32> to vector<8x1xf32>
    %cst_40 = arith.constant 3.200000e+01 : f32
    %80 = vector.broadcast %cst_40 : f32 to vector<8x1xf32>
    %81 = arith.divf %79, %80 : vector<8x1xf32>
    %82 = vector.broadcast %74 : vector<8x1xf32> to vector<8x32xf32>
    %83 = arith.subf %68, %82 : vector<8x32xf32>
    %cst_41 = arith.constant 9.99999997E-7 : f32
    %84 = vector.broadcast %cst_41 : f32 to vector<8x1xf32>
    %85 = arith.addf %81, %84 : vector<8x1xf32>
    %86 = math.rsqrt %85 : vector<8x1xf32>
    %87 = vector.broadcast %86 : vector<8x1xf32> to vector<8x32xf32>
    %88 = arith.mulf %83, %87 : vector<8x32xf32>
    %89 = vector.broadcast %69 : vector<1x32xf32> to vector<8x32xf32>
    %90 = arith.mulf %88, %89 : vector<8x32xf32>
    %91 = vector.broadcast %70 : vector<1x32xf32> to vector<8x32xf32>
    %92 = arith.addf %90, %91 : vector<8x32xf32>
    %93 = arith.truncf %92 : vector<8x32xf32> to vector<8x32xbf16>
    %c0_42 = arith.constant 0 : index
    %c0_43 = arith.constant 0 : index
    %c0_44 = arith.constant 0 : index
    %94 = vector.load %arg10[%c0_42, %c0_43, %c0_44] : memref<1x8x32xbf16, #tpu.memory_space<vmem>>, vector<1x8x32xbf16>
    %95 = vector.shape_cast %94 : vector<1x8x32xbf16> to vector<8x32xbf16>
    %96 = vector.shape_cast %93 : vector<8x32xbf16> to vector<1x8x32xbf16>
    tpu.vector_store %arg10[%c0_42, %c0_43, %c0_44], %96 {strides = array<i32>} : memref<1x8x32xbf16, #tpu.memory_space<vmem>>, vector<1x8x32xbf16>,
    return
  }
  func.func @transform_0(%arg0: i32, %arg1: i32) -> (i32, i32, i32) {
    %c0_i32 = arith.constant 0 : i32
    %c0_i32_0 = arith.constant 0 : i32
    return %arg0, %arg1, %c0_i32 : i32, i32, i32
  }
  func.func @transform_1(%arg0: i32, %arg1: i32) -> (i32, i32, i32) {
    %c0_i32 = arith.constant 0 : i32
    %c0_i32_0 = arith.constant 0 : i32
    %c0_i32_1 = arith.constant 0 : i32
    return %arg0, %c0_i32, %c0_i32_0 : i32, i32, i32
  }
  func.func @transform_2(%arg0: i32, %arg1: i32) -> (i32, i32, i32) {
    %c0_i32 = arith.constant 0 : i32
    %c0_i32_0 = arith.constant 0 : i32
    %c0_i32_1 = arith.constant 0 : i32
    return %arg0, %c0_i32, %c0_i32_0 : i32, i32, i32
  }
  func.func @transform_3(%arg0: i32, %arg1: i32) -> (i32, i32) {
    %c0_i32 = arith.constant 0 : i32
    %c0_i32_0 = arith.constant 0 : i32
    %c0_i32_1 = arith.constant 0 : i32
    return %c0_i32, %c0_i32_0 : i32, i32
  }
  func.func @transform_4(%arg0: i32, %arg1: i32) -> (i32, i32) {
    %c0_i32 = arith.constant 0 : i32
    %c0_i32_0 = arith.constant 0 : i32
    %c0_i32_1 = arith.constant 0 : i32
    return %c0_i32, %c0_i32_0 : i32, i32
  }
  func.func @transform_5(%arg0: i32, %arg1: i32) -> (i32, i32) {
    %c0_i32 = arith.constant 0 : i32
    %c0_i32_0 = arith.constant 0 : i32
    %c0_i32_1 = arith.constant 0 : i32
    return %c0_i32, %c0_i32_0 : i32, i32
  }
  func.func @transform_6(%arg0: i32, %arg1: i32) -> (i32, i32) {
    %c0_i32 = arith.constant 0 : i32
    %c0_i32_0 = arith.constant 0 : i32
    %c0_i32_1 = arith.constant 0 : i32
    return %c0_i32, %c0_i32_0 : i32, i32
  }
  func.func @transform_7(%arg0: i32, %arg1: i32) -> (i32, i32) {
    %c0_i32 = arith.constant 0 : i32
    %c0_i32_0 = arith.constant 0 : i32
    %c0_i32_1 = arith.constant 0 : i32
    return %c0_i32, %c0_i32_0 : i32, i32
  }
  func.func @transform_8(%arg0: i32, %arg1: i32) -> (i32, i32, i32) {
    %c0_i32 = arith.constant 0 : i32
    %c0_i32_0 = arith.constant 0 : i32
    return %arg0, %arg1, %c0_i32 : i32, i32, i32
  }
}

module attributes {stable_mosaic.version = 11 : i64} {
  func.func @_ffn_ln_kernel(%arg0: i32, %arg1: i32, %arg2: memref<1x8x32xbf16, #tpu.memory_space<vmem>>, %arg3: memref<32x64xbf16, #tpu.memory_space<vmem>>, %arg4: memref<1x64xf32, #tpu.memory_space<vmem>>, %arg5: memref<64x32xbf16, #tpu.memory_space<vmem>>, %arg6: memref<1x32xf32, #tpu.memory_space<vmem>>, %arg7: memref<1x32xf32, #tpu.memory_space<vmem>>, %arg8: memref<1x32xf32, #tpu.memory_space<vmem>>, %arg9: memref<1x8x32xbf16, #tpu.memory_space<vmem>>) attributes {dimension_semantics = [#tpu.dimension_semantics<parallel>, #tpu.dimension_semantics<parallel>], iteration_bounds = array<i64: 2, 1>, scalar_prefetch = 0 : i64, scratch_operands = 0 : i64, tpu.core_type = #tpu.core_type<tc>, window_params = [{transform_indices = @transform_0, window_bounds = array<i64: 1, 8, 32>}, {pipeline_mode = #tpu.pipeline_mode<synchronous>, transform_indices = @transform_1, window_bounds = array<i64: 32, 64>}, {pipeline_mode = #tpu.pipeline_mode<synchronous>, transform_indices = @transform_2, window_bounds = array<i64: 1, 64>}, {pipeline_mode = #tpu.pipeline_mode<synchronous>, transform_indices = @transform_3, window_bounds = array<i64: 64, 32>}, {pipeline_mode = #tpu.pipeline_mode<synchronous>, transform_indices = @transform_4, window_bounds = array<i64: 1, 32>}, {pipeline_mode = #tpu.pipeline_mode<synchronous>, transform_indices = @transform_5, window_bounds = array<i64: 1, 32>}, {pipeline_mode = #tpu.pipeline_mode<synchronous>, transform_indices = @transform_6, window_bounds = array<i64: 1, 32>}, {transform_indices = @transform_7, window_bounds = array<i64: 1, 8, 32>}]} {
    %c0 = arith.constant 0 : index
    %c0_0 = arith.constant 0 : index
    %c0_1 = arith.constant 0 : index
    %0 = vector.load %arg2[%c0, %c0_0, %c0_1] : memref<1x8x32xbf16, #tpu.memory_space<vmem>>, vector<1x8x32xbf16>
    %1 = vector.shape_cast %0 : vector<1x8x32xbf16> to vector<8x32xbf16>
    %c0_2 = arith.constant 0 : index
    %c0_3 = arith.constant 0 : index
    %2 = vector.load %arg3[%c0_2, %c0_3] : memref<32x64xbf16, #tpu.memory_space<vmem>>, vector<32x64xbf16>
    %cst = arith.constant dense<0.000000e+00> : vector<8x64xf32>
    %3 = tpu.matmul %1, %2, %cst {dimension_numbers = #tpu.dot_dimension_numbers<[1], [0], [0], [1], [0, 0, 1, 1], [], []>} : vector<8x32xbf16>, vector<32x64xbf16>, vector<8x64xf32> -> vector<8x64xf32>
    %c0_4 = arith.constant 0 : index
    %c0_5 = arith.constant 0 : index
    %4 = vector.load %arg4[%c0_4, %c0_5] : memref<1x64xf32, #tpu.memory_space<vmem>>, vector<1x64xf32>
    %5 = vector.broadcast %4 : vector<1x64xf32> to vector<8x64xf32>
    %6 = arith.addf %3, %5 : vector<8x64xf32>
    %cst_6 = arith.constant 0.000000e+00 : f32
    %7 = vector.broadcast %cst_6 : f32 to vector<8x64xf32>
    %8 = arith.maximumf %6, %7 : vector<8x64xf32>
    %9 = arith.truncf %8 : vector<8x64xf32> to vector<8x64xbf16>
    %c0_7 = arith.constant 0 : index
    %c0_8 = arith.constant 0 : index
    %10 = vector.load %arg5[%c0_7, %c0_8] : memref<64x32xbf16, #tpu.memory_space<vmem>>, vector<64x32xbf16>
    %cst_9 = arith.constant dense<0.000000e+00> : vector<8x32xf32>
    %11 = tpu.matmul %9, %10, %cst_9 {dimension_numbers = #tpu.dot_dimension_numbers<[1], [0], [0], [1], [0, 0, 1, 1], [], []>} : vector<8x64xbf16>, vector<64x32xbf16>, vector<8x32xf32> -> vector<8x32xf32>
    %c0_10 = arith.constant 0 : index
    %c0_11 = arith.constant 0 : index
    %12 = vector.load %arg6[%c0_10, %c0_11] : memref<1x32xf32, #tpu.memory_space<vmem>>, vector<1x32xf32>
    %13 = vector.broadcast %12 : vector<1x32xf32> to vector<8x32xf32>
    %14 = arith.addf %11, %13 : vector<8x32xf32>
    %15 = arith.extf %1 : vector<8x32xbf16> to vector<8x32xf32>
    %16 = arith.addf %14, %15 : vector<8x32xf32>
    %c0_12 = arith.constant 0 : index
    %c0_13 = arith.constant 0 : index
    %17 = vector.load %arg7[%c0_12, %c0_13] : memref<1x32xf32, #tpu.memory_space<vmem>>, vector<1x32xf32>
    %c0_14 = arith.constant 0 : index
    %c0_15 = arith.constant 0 : index
    %18 = vector.load %arg8[%c0_14, %c0_15] : memref<1x32xf32, #tpu.memory_space<vmem>>, vector<1x32xf32>
    %cst_16 = arith.constant dense<0.000000e+00> : vector<8xf32>
    %19 = vector.multi_reduction <add>, %16, %cst_16 [1] : vector<8x32xf32> to vector<8xf32>
    %20 = vector.shape_cast %19 : vector<8xf32> to vector<8x1xf32>
    %cst_17 = arith.constant 3.200000e+01 : f32
    %21 = vector.broadcast %cst_17 : f32 to vector<8x1xf32>
    %22 = arith.divf %20, %21 : vector<8x1xf32>
    %23 = vector.broadcast %22 : vector<8x1xf32> to vector<8x32xf32>
    %24 = arith.subf %16, %23 : vector<8x32xf32>
    %25 = arith.mulf %24, %24 : vector<8x32xf32>
    %cst_18 = arith.constant dense<0.000000e+00> : vector<8xf32>
    %26 = vector.multi_reduction <add>, %25, %cst_18 [1] : vector<8x32xf32> to vector<8xf32>
    %27 = vector.shape_cast %26 : vector<8xf32> to vector<8x1xf32>
    %cst_19 = arith.constant 3.200000e+01 : f32
    %28 = vector.broadcast %cst_19 : f32 to vector<8x1xf32>
    %29 = arith.divf %27, %28 : vector<8x1xf32>
    %30 = vector.broadcast %22 : vector<8x1xf32> to vector<8x32xf32>
    %31 = arith.subf %16, %30 : vector<8x32xf32>
    %cst_20 = arith.constant 9.99999997E-7 : f32
    %32 = vector.broadcast %cst_20 : f32 to vector<8x1xf32>
    %33 = arith.addf %29, %32 : vector<8x1xf32>
    %34 = math.rsqrt %33 : vector<8x1xf32>
    %35 = vector.broadcast %34 : vector<8x1xf32> to vector<8x32xf32>
    %36 = arith.mulf %31, %35 : vector<8x32xf32>
    %37 = vector.broadcast %17 : vector<1x32xf32> to vector<8x32xf32>
    %38 = arith.mulf %36, %37 : vector<8x32xf32>
    %39 = vector.broadcast %18 : vector<1x32xf32> to vector<8x32xf32>
    %40 = arith.addf %38, %39 : vector<8x32xf32>
    %41 = arith.truncf %40 : vector<8x32xf32> to vector<8x32xbf16>
    %c0_21 = arith.constant 0 : index
    %c0_22 = arith.constant 0 : index
    %c0_23 = arith.constant 0 : index
    %42 = vector.load %arg9[%c0_21, %c0_22, %c0_23] : memref<1x8x32xbf16, #tpu.memory_space<vmem>>, vector<1x8x32xbf16>
    %43 = vector.shape_cast %42 : vector<1x8x32xbf16> to vector<8x32xbf16>
    %44 = vector.shape_cast %41 : vector<8x32xbf16> to vector<1x8x32xbf16>
    tpu.vector_store %arg9[%c0_21, %c0_22, %c0_23], %44 {strides = array<i32>} : memref<1x8x32xbf16, #tpu.memory_space<vmem>>, vector<1x8x32xbf16>,
    return
  }
  func.func @transform_0(%arg0: i32, %arg1: i32) -> (i32, i32, i32) {
    %c0_i32 = arith.constant 0 : i32
    %c0_i32_0 = arith.constant 0 : i32
    return %arg0, %arg1, %c0_i32 : i32, i32, i32
  }
  func.func @transform_1(%arg0: i32, %arg1: i32) -> (i32, i32) {
    %c0_i32 = arith.constant 0 : i32
    %c0_i32_0 = arith.constant 0 : i32
    %c0_i32_1 = arith.constant 0 : i32
    return %c0_i32, %c0_i32_0 : i32, i32
  }
  func.func @transform_2(%arg0: i32, %arg1: i32) -> (i32, i32) {
    %c0_i32 = arith.constant 0 : i32
    %c0_i32_0 = arith.constant 0 : i32
    %c0_i32_1 = arith.constant 0 : i32
    return %c0_i32, %c0_i32_0 : i32, i32
  }
  func.func @transform_3(%arg0: i32, %arg1: i32) -> (i32, i32) {
    %c0_i32 = arith.constant 0 : i32
    %c0_i32_0 = arith.constant 0 : i32
    %c0_i32_1 = arith.constant 0 : i32
    return %c0_i32, %c0_i32_0 : i32, i32
  }
  func.func @transform_4(%arg0: i32, %arg1: i32) -> (i32, i32) {
    %c0_i32 = arith.constant 0 : i32
    %c0_i32_0 = arith.constant 0 : i32
    %c0_i32_1 = arith.constant 0 : i32
    return %c0_i32, %c0_i32_0 : i32, i32
  }
  func.func @transform_5(%arg0: i32, %arg1: i32) -> (i32, i32) {
    %c0_i32 = arith.constant 0 : i32
    %c0_i32_0 = arith.constant 0 : i32
    %c0_i32_1 = arith.constant 0 : i32
    return %c0_i32, %c0_i32_0 : i32, i32
  }
  func.func @transform_6(%arg0: i32, %arg1: i32) -> (i32, i32) {
    %c0_i32 = arith.constant 0 : i32
    %c0_i32_0 = arith.constant 0 : i32
    %c0_i32_1 = arith.constant 0 : i32
    return %c0_i32, %c0_i32_0 : i32, i32
  }
  func.func @transform_7(%arg0: i32, %arg1: i32) -> (i32, i32, i32) {
    %c0_i32 = arith.constant 0 : i32
    %c0_i32_0 = arith.constant 0 : i32
    return %arg0, %arg1, %c0_i32 : i32, i32, i32
  }
}

</mosaic_0001>

<bundles_post_ra>
// kernel: decoder_forward.7
= control target key start
LH: loop header
LB: loop body
LE: loop exit
PB: predicated region body
PF: predicated region fallthrough
CT: control target
= control target key end

     0   :  { %s622_s27 = smov 0   ;;  %s675_s0 = inlined_call_operand.vmem [shape: f32[2,8,32], index: 0, kind: input, shape index: {}]   ;;  %s676_s1 = inlined_call_operand.vmem [shape: f32[2,8,56], index: 1, kind: input, shape index: {}]   ;;  %s677_s2 = inlined_call_operand.vmem [shape: f32[2,8,1], index: 2, kind: input, shape index: {}]   ;;  %s678_s3 = inlined_call_operand.vmem [shape: bf16[56,32], index: 3, kind: input, shape index: {}]   ;;  %s679_s4 = inlined_call_operand.vmem [shape: f32[1,32], index: 4, kind: input, shape index: {}]   ;;  %s680_s5 = inlined_call_operand.vmem [shape: f32[8,32], index: 5, kind: input, shape index: {}]   ;;  %s681_s6 = inlined_call_operand.vmem [shape: f32[1,32], index: 6, kind: input, shape index: {}]   ;;  %s682_s7 = inlined_call_operand.vmem [shape: f32[1,32], index: 7, kind: input, shape index: {}]   ;;  %s683_s8 = inlined_call_operand.vmem [shape: bf16[2,8,32], index: 8, kind: output, shape index: {}]  }
   0x1 LB: > { %s522_s28 = sadd.s32 4294967295, %s573_s27   ;;  %p526_p0 = scmp.ge.s32.totalorder %s573_s27, 1  ;;  %s573_s27 = sphi %s622_s27, %s18_s27  }
   0x2   : > { %p279_p1 = scmp.lt.s32.totalorder %s573_s27, 3 }
   0x4   : > { %p280_p2 = pnand %p526_p0, %p279_p1 }
   0x5   : > { %p319_p3 = scmp.lt.s32.totalorder (!%p280_p2), %s522_s28, 1 }
   0x6   : > { %283 = sbr.rel (%p280_p2) target bundleno = 434 (0x1b2), region = 52 }
   0xb   : > { %v346_v0 = vld [vmem:[%s678_s3 + $0x18] sm:$0xf]  ;;  %vm376_vm0 = vcmask 1043456   ;;  %s685_s28 = smov (!%p319_p3, %s522_s28), 1  ;;  %v575_v2 = vmov 0   ;;  %v548_v5 = vld [vmem:[%s678_s3 + $0x10] sm:$0xff] }
   0xc   : > { %v364_v1 = vunpack.c.l.b16 %v346_v0  ;;  %559 = vset.pattern.permute.xlu0 %v575_v2  ;;  %s527_s9 = sshll.u32 %s685_s28, 3  ;;  %v547_v8 = vld [vmem:[%s678_s3 + $0x8] sm:$0xff]  ;;  %v546_v9 = vld [vmem:[%s678_s3] sm:$0xff]  ;;  %vm372_vm2 = vcmask 457728   ;;  %vm404_vm4 = vcmask 261120   ;;  %v576_v22 = vmov 32.0  }
   0xd   : > { %s330_s14 = scalar_lea.vmem %s677_s2, %s527_s9  ;;  %s326_s19 = scalar_lea.vmem %s676_s1, %s527_s9  ;;  %v560_v12 = vld [vmem:[%s679_s4] ss:$0 sm:$0xff]  ;;  %563 = vrcp.f32 %v576_v22  ;;  %vm443_vm9 = vcmask 257024  }
   0xe   : > { %v368_v3 = vpack.c.b16 %v364_v1, %v364_v1  ;;  %v338_v6 = vld [vmem:[%s330_s14] sm:$0xff]  ;;  %s322_s26 = scalar_lea.vmem %s675_s0, %s527_s9  ;;  %s530_s13 = sshll.u32 %s685_s28, 2 }
   0xf   : > { %vm393_vm1 = vcmp.gt.f32.partialorder %v338_v6, 0.0  ;;  %v337_v10 = vld [vmem:[%s326_s19] sm:$0xff]  ;;  %s334_s16 = scalar_lea.vmem %s683_s8, %s530_s13 }
  0x10   : > { %v378_v4 = vsel %vm376_vm0, %v368_v3, 0  ;;  %v394_v7 = vsel %vm393_vm1, 1, %v575_v2  ;;  %v339_v11 = vpack.c.bf16 %v337_v10, %v337_v10  ;;  %v336_v15 = vld [vmem:[%s322_s26] sm:$0xff] }
  0x11   : > { %384 = vmatpush.bf16.msra.mxu0 %v378_v4  ;;  %396 = vperm.xlu0 %559, %v394_v7   ;;  %v400_v17 = vld [vmem:[%s680_s5] sm:$0xff] }
  0x12   : > { %v561_v43 = vld [vmem:[%s681_s6] ss:$0 sm:$0xff] }
  0x13   : > { %v564_v23 = vpop.eup %563  ;;  %v562_v45 = vld [vmem:[%s682_s7] ss:$0 sm:$0xff] }
  0x14   : > { %v409_v24 = vmul.f32 32.0, %v564_v23  ;;  %vm413_vm5 = vweird.f32 %v564_v23 }
  0x15   : > { %385 = vmatpush.bf16.msra.mxu0 %v548_v5 }
  0x16   : > { %v410_v25 = vsub.f32 1.0, %v409_v24 }
  0x18   : > { %v411_v26 = vmul.f32 %v564_v23, %v410_v25 }
  0x19   : > { %386 = vmatpush.bf16.msra.mxu0 %v547_v8 }
  0x1a   : > { %v412_v27 = vadd.f32 %v564_v23, %v411_v26 }
  0x1c   : > { %v414_v28 = vsel %vm413_vm5, %v564_v23, %v412_v27 }
  0x1d   : > { %387 = vmatpush.bf16.msra.mxu0 %v546_v9 }
  0x20   : > { %543 = vmatmul.msk.bf16.vlgmr.msra.gmra.mxu0 %vm372_vm2, %v339_v11 }
  0x83   : > { %v397_v13 = vpop.permute.xlu0 %396 }
  0x84   : > { %vm398_vm3 = vcmp.eq.s32.totalorder %v397_v13, 1 }
  0x9d   : > { %v389_v14 = vpop.f32.mrf.mxu0 }
  0x9e   : > { %v390_v16 = vadd.f32 %v560_v12, %v389_v14 }
  0xa0   : > { %v399_v18 = vsel %vm398_vm3, %v390_v16, %v336_v15 }
  0xa1   : > { %v401_v19 = vadd.f32 %v400_v17, %v399_v18 }
  0xa3   : > { %v405_v20 = vsel %vm404_vm4, %v401_v19, 0.0 }
  0xa4   : > { %406 = vadd.xlane.f32.xlu0 %v405_v20 }
  0xa5   : > { %v391_v21 = vpop.f32.mrf.mxu0 }
 0x117   : > { %v407_v29 = vpop.xlane.xlu0 %406 }
 0x118   : > { %v415_v30 = vmul.f32 %v414_v28, %v407_v29 }
 0x11a   : > { %v416_v31 = vsub.f32 %v401_v19, %v415_v30 }
 0x11c   : > { %v417_v32 = vmul.f32 %v416_v31, %v416_v31 }
 0x11e   : > { %v418_v33 = vsel %vm404_vm4, %v417_v32, 0.0 }
 0x11f   : > { %419 = vadd.xlane.f32.xlu1 %v418_v33 }
 0x192   : > { %v420_v34 = vpop.xlane.xlu1 %419 }
 0x193   : > { %v421_v35 = vmul.f32 %v420_v34, %v414_v28 }
 0x195   : > { %v422_v36 = vadd.f32 1e-06, %v421_v35 }
 0x197   : > { %565 = vrsqrt.f32 %v422_v36  ;;  %vm429_vm7 = vweird.f32 %v422_v36 }
 0x19d   : > { %v566_v37 = vpop.eup %565 }
 0x19e   : > { %v424_v38 = vmul.f32 %v566_v37, %v422_v36  ;;  %vm430_vm6 = vweird.f32 %v566_v37 }
 0x19f   : > { %vm431_vm8 = vmor %vm429_vm7, %vm430_vm6 }
 0x1a0   : > { %v425_v39 = vmul.f32 %v566_v37, %v424_v38 }
 0x1a2   : > { %v426_v40 = vmul.f32 0.5, %v425_v39 }
 0x1a4   : > { %v427_v41 = vsub.f32 1.5, %v426_v40 }
 0x1a6   : > { %v428_v42 = vmul.f32 %v566_v37, %v427_v41 }
 0x1a8   : > { %v432_v44 = vsel %vm431_vm8, %v566_v37, %v428_v42 }
 0x1a9   : > { %v433_v46 = vmul.f32 %v432_v44, %v416_v31 }
 0x1ab   : > { %v437_v47 = vmul.f32 %v561_v43, %v433_v46 }
 0x1ad   : > { %v441_v48 = vadd.f32 %v562_v45, %v437_v47 }
 0x1af   : > { %v442_v49 = vpack.c.bf16 %v441_v48, %v441_v48 }
 0x1b1   : > { %444 = vst.msk [vmem:[%s334_s16] sm:$0xf] %vm443_vm9, %v442_v49 }
 0x1b2 PF: > { %s18_s27 = sadd.s32 1, %s573_s27  }
 0x1b3   : > { %p15_p4 = scmp.ge.s32.totalorder %s18_s27, 4  }
 0x1b5   :  { %17 = sbr.rel (!%p15_p4) target bundleno = 1 (0x1), region = 88 }

// kernel: decoder_forward.8
= control target key start
LH: loop header
LB: loop body
LE: loop exit
PB: predicated region body
PF: predicated region fallthrough
CT: control target
= control target key end

     0   :  { %s695_s21 = smov 0   ;;  %s755_s0 = inlined_call_operand.vmem [shape: bf16[2,8,32], index: 0, kind: input, shape index: {}]   ;;  %s756_s1 = inlined_call_operand.vmem [shape: s8[2,8,8], index: 1, kind: input, shape index: {}]   ;;  %s757_s2 = inlined_call_operand.vmem [shape: bf16[32,96], index: 2, kind: input, shape index: {}]   ;;  %s758_s3 = inlined_call_operand.vmem [shape: bf16[32,32], index: 3, kind: input, shape index: {}]   ;;  %s759_s4 = inlined_call_operand.vmem [shape: f32[1,32], index: 4, kind: input, shape index: {}]   ;;  %s760_s5 = inlined_call_operand.vmem [shape: f32[1,32], index: 5, kind: input, shape index: {}]   ;;  %s761_s6 = inlined_call_operand.vmem [shape: bf16[2,8,32], index: 6, kind: output, shape index: {}]  }
   0x1 LB: > { %s578_s22 = sadd.s32 4294967295, %s650_s21   ;;  %p582_p0 = scmp.ge.s32.totalorder %s650_s21, 1  ;;  %s650_s21 = sphi %s695_s21, %s16_s21  }
   0x2   : > { %p220_p1 = scmp.lt.s32.totalorder %s650_s21, 3 }
   0x4   : > { %p221_p2 = pnand %p582_p0, %p220_p1 }
   0x5   : > { %p252_p3 = scmp.lt.s32.totalorder (!%p221_p2), %s578_s22, 1  ;;  %s652_s7 = smov (!%p221_p2), 112  }
   0x6   : > { %224 = sbr.rel (%p221_p2) target bundleno = 1307 (0x51b), region = 44  ;;  %s653_s8 = smov (!%p221_p2), 96  }
   0x7   : > { %s654_s9 = smov (!%p221_p2), 80   ;;  %s655_s10 = smov (!%p221_p2), 64  }
   0x8   : > { %s656_s11 = smov (!%p221_p2), 48   ;;  %s658_s18 = smov (!%p221_p2), 16  }
   0xb   : > { %v611_v0 = vld [vmem:[%s757_s2 + $0x8] sm:$0xff]  ;;  %v610_v1 = vld [vmem:[%s757_s2] sm:$0xff]  ;;  %s763_s22 = smov (!%p252_p3, %s578_s22), 1  ;;  %vm284_vm0 = vcmask 261120   ;;  %vm309_vm1 = vcmask 130048   ;;  %vm352_vm2 = vcmask 1043456  }
   0xc   : > { %294 = vmatpush.bf16.msra.mxu0 %v611_v0  ;;  %s583_s27 = sshll.u32 %s763_s22, 2  ;;  %s584_s12 = sshll.u32 %s763_s22, 1  ;;  %v657_v18 = vmov 0   ;;  %vm334_vm5 = vcmask 64512   ;;  %v613_v49 = vld [vmem:[%s758_s3 + $0x8] sm:$0xff]  ;;  %vm370_vm6 = vcmask 125952  }
   0xd   : > { %s255_s30 = scalar_lea.vmem %s755_s0, %s583_s27  ;;  %s259_s15 = scalar_lea.vmem %s756_s1, %s584_s12  ;;  %v612_v56 = vld [vmem:[%s758_s3] sm:$0xff]  ;;  %vm435_vm7 = vcmask 257152   ;;  %v659_v0 = vmov 32.0   ;;  %vm511_vm12 = vcmask 257024  }
   0xe   : > { %v717_v2 = vld [vmem:[%s255_s30] sm:$0xf]  ;;  %s263_s30 = scalar_lea.vmem %s761_s6, %s583_s27 }
   0xf   : > { %v302_v17 = vld [vmem:[%s259_s15] sm:$0x3]  ;;  %v442_v59 = vunpack.c.l.bf16 %v717_v2 }
  0x10   : > { %295 = vmatpush.bf16.msra.mxu0 %v610_v1  ;;  %vm303_vm3 = vnez %v302_v17 }
  0x11   : > { %v330_v19 = vsel %vm303_vm3, 16843009, %v657_v18 }
  0x12   : > { %v331_v20 = vunpack.c.0.s8 %v330_v19 }
  0x13   : > { %594 = vmatmul.msk.bf16.vlgmr.msra.gmra.mxu0 %vm284_vm0, %v717_v2 }
  0x14   : > { %vm332_vm4 = vcmp.ne.s32.totalorder %v331_v20, 0  ;;  %464 = vmatpush.bf16.msrb.mxu0 %v613_v49 }
  0x18   : > { %465 = vmatpush.bf16.msrb.mxu0 %v612_v56 }
  0x90   : > { %v297_v3 = vpop.f32.mrf.mxu0 }
  0x91   : > { %v301_v4 = vpack.c.bf16 %v297_v3, %v297_v3 }
  0x93   : > { %v305_v5 = vunpack.c.l.b16 %v301_v4 }
  0x95   : > { %v306_v6 = vpack.c.b16 %v305_v5, %v305_v5 }
  0x97   : > { %372 = vrot.lane.b32.xlu1 %v306_v6, %s652_s7  ;;  %307 = vrot.lane.b32.xlu0 %v306_v6, %s653_s8 }
  0x98   : > { %v299_v7 = vpop.f32.mrf.mxu0 }
  0x9f   : > { %374 = vrot.lane.b32.xlu0 %v306_v6, %s654_s9 }
  0xa7   : > { %347 = vrot.lane.b32.xlu0 %v306_v6, %s655_s10 }
  0xaf   : > { %409 = vrot.lane.b32.xlu0 %v306_v6, %s656_s11 }
 0x109   : > { %v308_v8 = vpop.permute.xlu0 %307  ;;  %v373_v12 = vpop.permute.xlu1 %372 }
 0x10a   : > { %v314_v9 = vsel %vm309_vm1, %v308_v8, 0 }
 0x10b   : > { %323 = vmatpush.bf16.xpose.msra.mxu1 %v314_v9 }
 0x111   : > { %v375_v10 = vpop.permute.xlu0 %374 }
 0x112   : > { %595 = vmatmul.msk.bf16.vlgmr.msra.gmra.mxu1 %vm309_vm1, %v301_v4  ;;  %v380_v11 = vsel %vm309_vm1, %v375_v10, 0 }
 0x113   : > { %389 = vmatpush.bf16.xpose.msra.mxu3 %v380_v11 }
 0x119   : > { %v348_v13 = vpop.permute.xlu0 %347 }
 0x11a   : > { %597 = vmatmul.msk.bf16.vlgmr.msra.gmra.mxu3 %vm309_vm1, %v373_v12  ;;  %v354_v14 = vsel %vm352_vm2, %v348_v13, 0 }
 0x11b   : > { %363 = vmatpush.bf16.msra.mxu2 %v354_v14 }
 0x121   : > { %v410_v15 = vpop.permute.xlu0 %409 }
 0x122   : > { %v415_v16 = vsel %vm352_vm2, %v410_v15, 0 }
 0x123   : > { %424 = vmatpush.bf16.msrb.mxu2 %v415_v16 }
 0x18f   : > { %v325_v21 = vpop.f32.mrf.mxu1 }
 0x190   : > { %v329_v22 = vmul.f32 0.25, %v325_v21  ;;  %v630_v21 = vld [vmem:[%s759_s4] ss:$0 sm:$0xff] }
 0x192   : > { %v333_v23 = vsel %vm332_vm4, %v329_v22, -1e+09 }
 0x193   : > { %v335_v24 = vsel %vm334_vm5, %v333_v23, -inf }
 0x194   : > { %336 = vmax.xlane.f32.xlu1 %v335_v24 }
 0x197   : > { %v327_v25 = vpop.f32.mrf.mxu1 }
 0x19d   : > { %v391_v26 = vpop.f32.mrf.mxu3 }
 0x19e   : > { %v395_v27 = vmul.f32 0.25, %v391_v26 }
 0x1a0   : > { %v396_v28 = vsel %vm332_vm4, %v395_v27, -1e+09 }
 0x1a1   : > { %v397_v29 = vsel %vm334_vm5, %v396_v28, -inf }
 0x1a2   : > { %398 = vmax.xlane.f32.xlu2 %v397_v29 }
 0x1a5   : > { %v393_v30 = vpop.f32.mrf.mxu3 }
 0x207   : > { %v337_v31 = vpop.xlane.xlu1 %336 }
 0x208   : > { %v338_v32 = vsub.f32 %v333_v23, %v337_v31  ;;  %v631_v23 = vld [vmem:[%s760_s5] ss:$0 sm:$0xff] }
 0x20a   : > { %v339_v33 = vmul.f32 1.442695, %v338_v32 }
 0x20c   : > { %632 = vpow2.f32 %v339_v33 }
 0x212   : > { %v633_v34 = vpop.eup %632 }
 0x213   : > { %v341_v35 = vsel %vm334_vm5, %v633_v34, 0.0 }
 0x214   : > { %342 = vadd.xlane.f32.xlu2 %v341_v35 }
 0x215   : > { %v399_v36 = vpop.xlane.xlu2 %398 }
 0x216   : > { %v400_v37 = vsub.f32 %v396_v28, %v399_v36 }
 0x218   : > { %v401_v38 = vmul.f32 1.442695, %v400_v37 }
 0x21a   : > { %634 = vpow2.f32 %v401_v38 }
 0x220   : > { %v635_v39 = vpop.eup %634 }
 0x221   : > { %v403_v40 = vsel %vm334_vm5, %v635_v39, 0.0 }
 0x222   : > { %404 = vadd.xlane.f32.xlu2 %v403_v40 }
 0x287   : > { %v343_v41 = vpop.xlane.xlu2 %342 }
 0x288   : > { %636 = vrcp.f32 %v343_v41 }
 0x28e   : > { %v637_v42 = vpop.eup %636 }
 0x28f   : > { %v345_v43 = vmul.f32 %v637_v42, %v633_v34 }
 0x291   : > { %v346_v44 = vpack.c.bf16 %v345_v43, %v345_v43 }
 0x293   : > { %596 = vmatmul.msk.bf16.vlgmr.msra.gmra.mxu2 %vm334_vm5, %v346_v44 }
 0x295   : > { %v405_v45 = vpop.xlane.xlu2 %404 }
 0x296   : > { %638 = vrcp.f32 %v405_v45 }
 0x297   : > { %640 = vrcp.f32 %v659_v0 }
 0x29c   : > { %v639_v46 = vpop.eup %638 }
 0x29d   : > { %v407_v47 = vmul.f32 %v639_v46, %v635_v39  ;;  %v641_v1 = vpop.eup %640 }
 0x29e   : > { %v477_v3 = vmul.f32 32.0, %v641_v1  ;;  %vm481_vm8 = vweird.f32 %v641_v1 }
 0x29f   : > { %v408_v48 = vpack.c.bf16 %v407_v47, %v407_v47 }
 0x2a0   : > { %v478_v4 = vsub.f32 1.0, %v477_v3 }
 0x2a2   : > { %v479_v5 = vmul.f32 %v641_v1, %v478_v4 }
 0x2a3   : > { %598 = vmatmul.msk.bf16.vlgmr.msrb.gmra.mxu2 %vm334_vm5, %v408_v48 }
 0x2a4   : > { %v480_v6 = vadd.f32 %v641_v1, %v479_v5 }
 0x2a6   : > { %v482_v7 = vsel %vm481_vm8, %v641_v1, %v480_v6 }
 0x316   : > { %v365_v50 = vpop.f32.mrf.mxu2 }
 0x317   : > { %v369_v51 = vpack.c.bf16 %v365_v50, %v365_v50 }
 0x319   : > { %371 = vst.msk [vmem:[#allocation2] sm:$0xf] %vm370_vm6, %v369_v51 }
 0x31e   : > { %v367_v52 = vpop.f32.mrf.mxu2 }
 0x326   : > { %v426_v53 = vpop.f32.mrf.mxu2 }
 0x327   : > { %v430_v54 = vpack.c.bf16 %v426_v53, %v426_v53 }
 0x329   : > { %432 = vrot.lane.b32.xlu2 %v430_v54, %s658_s18 }
 0x32e   : > { %v428_v55 = vpop.f32.mrf.mxu2 }
 0x383   : > { %v433_v57 = vpop.permute.xlu2 %432 }
 0x384   : > { %436 = vst.msk [vmem:[#allocation2] sm:$0xf] %vm435_vm7, %v433_v57 }
 0x38b   : > { %v437_v58 = vld [vmem:[#allocation2] sm:$0xf] }
 0x38c   : > { %607 = vmatmul.msk.bf16.vlgmr.msrb.gmra.mxu0 %vm284_vm0, %v437_v58 }
 0x409   : > { %v467_v60 = vpop.f32.mrf.mxu0 }
 0x40a   : > { %v468_v61 = vadd.f32 %v467_v60, %v442_v59 }
 0x40c   : > { %v473_v62 = vsel %vm284_vm0, %v468_v61, 0.0 }
 0x40d   : > { %474 = vadd.xlane.f32.xlu0 %v473_v62 }
 0x411   : > { %v469_v63 = vpop.f32.mrf.mxu0 }
 0x480   : > { %v475_v8 = vpop.xlane.xlu0 %474 }
 0x481   : > { %v483_v9 = vmul.f32 %v482_v7, %v475_v8 }
 0x483   : > { %v484_v10 = vsub.f32 %v468_v61, %v483_v9 }
 0x485   : > { %v485_v11 = vmul.f32 %v484_v10, %v484_v10 }
 0x487   : > { %v486_v2 = vsel %vm284_vm0, %v485_v11, 0.0 }
 0x488   : > { %487 = vadd.xlane.f32.xlu2 %v486_v2 }
 0x4fb   : > { %v488_v12 = vpop.xlane.xlu2 %487 }
 0x4fc   : > { %v489_v13 = vmul.f32 %v488_v12, %v482_v7 }
 0x4fe   : > { %v490_v14 = vadd.f32 1e-06, %v489_v13 }
 0x500   : > { %642 = vrsqrt.f32 %v490_v14  ;;  %vm497_vm10 = vweird.f32 %v490_v14 }
 0x506   : > { %v643_v15 = vpop.eup %642 }
 0x507   : > { %v492_v16 = vmul.f32 %v643_v15, %v490_v14  ;;  %vm498_vm9 = vweird.f32 %v643_v15 }
 0x508   : > { %vm499_vm11 = vmor %vm497_vm10, %vm498_vm9 }
 0x509   : > { %v493_v17 = vmul.f32 %v643_v15, %v492_v16 }
 0x50b   : > { %v494_v18 = vmul.f32 0.5, %v493_v17 }
 0x50d   : > { %v495_v19 = vsub.f32 1.5, %v494_v18 }
 0x50f   : > { %v496_v20 = vmul.f32 %v643_v15, %v495_v19 }
 0x511   : > { %v500_v22 = vsel %vm499_vm11, %v643_v15, %v496_v20 }
 0x512   : > { %v501_v24 = vmul.f32 %v500_v22, %v484_v10 }
 0x514   : > { %v505_v25 = vmul.f32 %v630_v21, %v501_v24 }
 0x516   : > { %v509_v26 = vadd.f32 %v631_v23, %v505_v25 }
 0x518   : > { %v510_v27 = vpack.c.bf16 %v509_v26, %v509_v26 }
 0x51a   : > { %512 = vst.msk [vmem:[%s263_s30] sm:$0xf] %vm511_vm12, %v510_v27 }
 0x51b PF: > { %s16_s21 = sadd.s32 1, %s650_s21  }
 0x51c   : > { %p13_p4 = scmp.ge.s32.totalorder %s16_s21, 4  }
 0x51e   :  { %15 = sbr.rel (!%p13_p4) target bundleno = 1 (0x1), region = 77 }

// kernel: decoder_forward.10
= control target key start
LH: loop header
LB: loop body
LE: loop exit
PB: predicated region body
PF: predicated region fallthrough
CT: control target
= control target key end

     0   :  { %s656_s24 = smov 0   ;;  %s658_s25 = smov 0   ;;  %s729_s0 = inlined_call_operand.vmem [shape: bf16[2,8,32], index: 0, kind: input, shape index: {}]   ;;  %s730_s1 = inlined_call_operand.vmem [shape: bf16[32,64], index: 1, kind: input, shape index: {}]   ;;  %s731_s2 = inlined_call_operand.vmem [shape: f32[1,64], index: 2, kind: input, shape index: {}]   ;;  %s732_s3 = inlined_call_operand.vmem [shape: bf16[64,32], index: 3, kind: input, shape index: {}]   ;;  %s733_s4 = inlined_call_operand.vmem [shape: f32[1,32], index: 4, kind: input, shape index: {}]   ;;  %s734_s5 = inlined_call_operand.vmem [shape: f32[1,32], index: 5, kind: input, shape index: {}]   ;;  %s735_s6 = inlined_call_operand.vmem [shape: f32[1,32], index: 6, kind: input, shape index: {}]   ;;  %s736_s7 = inlined_call_operand.vmem [shape: bf16[2,8,32], index: 7, kind: output, shape index: {}]  }
   0x1   :  { %s660_s26 = smov 0  }
   0x2 LB: > { %s29_s27 = sadd.s32 1, %s609_s25  ;;  %p521_p0 = scmp.ge.s32.totalorder %s613_s26, 1  ;;  %s613_s26 = sphi %s660_s26, %s17_s26   ;;  %s609_s25 = sphi %s658_s25, %s738_s25   ;;  %s605_s24 = sphi %s656_s24, %s737_s24  }
   0x3   : > { %p31_p1 = scmp.ge.s32.totalorder %s29_s27, 2  ;;  %p255_p2 = scmp.lt.s32.totalorder %s613_s26, 3 }
   0x5   : > { %s740_s27 = smov (%p31_p1, %s29_s27), 0  ;;  %p256_p3 = pnand %p521_p0, %p255_p2 }
   0x6   : > { %p291_p4 = scmp.lt.s32.totalorder (!%p256_p3), %s605_s24, 1 }
   0x7   : > { %259 = sbr.rel (%p256_p3) target bundleno = 553 (0x229), region = 48 }
   0xc   : > { %v553_v0 = vld [vmem:[%s730_s1 + $0x8] sm:$0xff]  ;;  %v557_v1 = vld [vmem:[%s732_s3 + $0x18] sm:$0xff]  ;;  %v552_v2 = vld [vmem:[%s730_s1] sm:$0xff]  ;;  %s742_s24 = smov (!%p291_p4, %s605_s24), 1  ;;  %vm327_vm0 = vcmask 261120   ;;  %vm382_vm1 = vcmask 523264  }
   0xd   : > { %337 = vmatpush.bf16.msra.mxu0 %v553_v0  ;;  %390 = vmatpush.bf16.msra.mxu1 %v557_v1  ;;  %v556_v3 = vld [vmem:[%s732_s3 + $0x10] sm:$0xff]  ;;  %s522_s13 = sshll.u32 %s742_s24, 2  ;;  %v555_v5 = vld [vmem:[%s732_s3 + $0x8] sm:$0xff]  ;;  %v554_v6 = vld [vmem:[%s732_s3] sm:$0xff]  ;;  %v615_v20 = vmov 32.0   ;;  %vm441_vm6 = vcmask 257024  }
   0xe   : > { %s297_s16 = scalar_lea.vmem %s729_s0, %s522_s13  ;;  %v583_v7 = vld [vmem:[%s731_s2] ss:$0 sm:$0xff]  ;;  %587 = vrcp.f32 %v615_v20  ;;  %s304_s12 = scalar_lea.vmem %s736_s7, %s522_s13 }
   0xf   : > { %v306_v4 = vld [vmem:[%s297_s16] sm:$0xf] }
  0x10   : > { %v584_v13 = vld [vmem:[%s733_s4] ss:$0 sm:$0xff]  ;;  %v399_v14 = vunpack.c.l.bf16 %v306_v4 }
  0x11   : > { %338 = vmatpush.bf16.msra.mxu0 %v552_v2  ;;  %391 = vmatpush.bf16.msra.mxu1 %v556_v3  ;;  %v585_v41 = vld [vmem:[%s734_s5] ss:$0 sm:$0xff] }
  0x12   : > { %v586_v43 = vld [vmem:[%s735_s6] ss:$0 sm:$0xff] }
  0x14   : > { %532 = vmatmul.msk.bf16.vlgmr.msra.gmra.mxu0 %vm327_vm0, %v306_v4  ;;  %v588_v21 = vpop.eup %587 }
  0x15   : > { %392 = vmatpush.bf16.msra.mxu1 %v555_v5  ;;  %v407_v22 = vmul.f32 32.0, %v588_v21  ;;  %vm411_vm2 = vweird.f32 %v588_v21 }
  0x17   : > { %v408_v23 = vsub.f32 1.0, %v407_v22 }
  0x19   : > { %393 = vmatpush.bf16.msra.mxu1 %v554_v6  ;;  %v409_v24 = vmul.f32 %v588_v21, %v408_v23 }
  0x1b   : > { %v410_v25 = vadd.f32 %v588_v21, %v409_v24 }
  0x1d   : > { %v412_v26 = vsel %vm411_vm2, %v588_v21, %v410_v25 }
  0x91   : > { %v340_v8 = vpop.f32.mrf.mxu0 }
  0x92   : > { %v341_v9 = vadd.f32 %v583_v7, %v340_v8 }
  0x94   : > { %v344_v10 = vmax.f32 %v341_v9, 0.0 }
  0x96   : > { %v345_v11 = vpack.c.bf16 %v344_v10, %v344_v10 }
  0x98   : > { %549 = vmatmul.msk.bf16.vlgmr.msra.gmra.mxu1 %vm382_vm1, %v345_v11 }
  0x99   : > { %v342_v12 = vpop.f32.mrf.mxu0 }
 0x115   : > { %v395_v15 = vpop.f32.mrf.mxu1 }
 0x116   : > { %v396_v16 = vadd.f32 %v584_v13, %v395_v15 }
 0x118   : > { %v400_v17 = vadd.f32 %v399_v14, %v396_v16 }
 0x11a   : > { %v403_v18 = vsel %vm327_vm0, %v400_v17, 0.0 }
 0x11b   : > { %404 = vadd.xlane.f32.xlu0 %v403_v18 }
 0x11d   : > { %v397_v19 = vpop.f32.mrf.mxu1 }
 0x18e   : > { %v405_v27 = vpop.xlane.xlu0 %404 }
 0x18f   : > { %v413_v28 = vmul.f32 %v412_v26, %v405_v27 }
 0x191   : > { %v414_v29 = vsub.f32 %v400_v17, %v413_v28 }
 0x193   : > { %v415_v30 = vmul.f32 %v414_v29, %v414_v29 }
 0x195   : > { %v416_v31 = vsel %vm327_vm0, %v415_v30, 0.0 }
 0x196   : > { %417 = vadd.xlane.f32.xlu0 %v416_v31 }
 0x209   : > { %v418_v32 = vpop.xlane.xlu0 %417 }
 0x20a   : > { %v419_v33 = vmul.f32 %v418_v32, %v412_v26 }
 0x20c   : > { %v420_v34 = vadd.f32 1e-06, %v419_v33 }
 0x20e   : > { %589 = vrsqrt.f32 %v420_v34  ;;  %vm427_vm4 = vweird.f32 %v420_v34 }
 0x214   : > { %v590_v35 = vpop.eup %589 }
 0x215   : > { %v422_v36 = vmul.f32 %v590_v35, %v420_v34  ;;  %vm428_vm3 = vweird.f32 %v590_v35 }
 0x216   : > { %vm429_vm5 = vmor %vm427_vm4, %vm428_vm3 }
 0x217   : > { %v423_v37 = vmul.f32 %v590_v35, %v422_v36 }
 0x219   : > { %v424_v38 = vmul.f32 0.5, %v423_v37 }
 0x21b   : > { %v425_v39 = vsub.f32 1.5, %v424_v38 }
 0x21d   : > { %v426_v40 = vmul.f32 %v590_v35, %v425_v39 }
 0x21f   : > { %v430_v42 = vsel %vm429_vm5, %v590_v35, %v426_v40 }
 0x220   : > { %v431_v44 = vmul.f32 %v430_v42, %v414_v29 }
 0x222   : > { %v435_v45 = vmul.f32 %v585_v41, %v431_v44 }
 0x224   : > { %v439_v46 = vadd.f32 %v586_v43, %v435_v45 }
 0x226   : > { %v440_v47 = vpack.c.bf16 %v439_v46, %v439_v46 }
 0x228   : > { %442 = vst.msk [vmem:[%s304_s12] sm:$0xf] %vm441_vm6, %v440_v47 }
 0x229 PF: > { %s17_s26 = sadd.s32 1, %s613_s26   ;;  %s737_s24 = smov %s609_s25 }
 0x22a   : > { %p14_p5 = scmp.ge.s32.totalorder %s17_s26, 4   ;;  %s738_s25 = smov %s740_s27 }
 0x22c   :  { %16 = sbr.rel (!%p14_p5) target bundleno = 2 (0x2), region = 78 }

// kernel: decoder_forward.9
= control target key start
LH: loop header
LB: loop body
LE: loop exit
PB: predicated region body
PF: predicated region fallthrough
CT: control target
= control target key end

     0   :  { %s911_s27 = smov 0   ;;  %s913_s28 = smov 0   ;;  %s1010_s0 = inlined_call_operand.vmem [shape: bf16[2,8,32], index: 0, kind: input, shape index: {}]   ;;  %s1011_s1 = inlined_call_operand.vmem [shape: bf16[2,8,32], index: 1, kind: input, shape index: {}]   ;;  %s1012_s2 = inlined_call_operand.vmem [shape: s8[2,1,8], index: 2, kind: input, shape index: {}]   ;;  %s1013_s3 = inlined_call_operand.vmem [shape: bf16[32,32], index: 3, kind: input, shape index: {}]   ;;  %s1014_s4 = inlined_call_operand.vmem [shape: bf16[32,64], index: 4, kind: input, shape index: {}]   ;;  %s1015_s5 = inlined_call_operand.vmem [shape: bf16[32,32], index: 5, kind: input, shape index: {}]   ;;  %s1016_s6 = inlined_call_operand.vmem [shape: f32[1,32], index: 6, kind: input, shape index: {}]   ;;  %s1017_s7 = inlined_call_operand.vmem [shape: f32[1,32], index: 7, kind: input, shape index: {}]   ;;  %s1018_s8 = inlined_call_operand.vmem [shape: bf16[2,8,32], index: 8, kind: output, shape index: {}]  }
   0x1   :  { %s915_s29 = smov 0  }
   0x2 LB: > { %s30_s30 = sadd.s32 1, %s854_s28  ;;  %p749_p0 = scmp.ge.s32.totalorder %s858_s29, 1  ;;  %s858_s29 = sphi %s915_s29, %s18_s29   ;;  %s854_s28 = sphi %s913_s28, %s1022_s28   ;;  %s850_s27 = sphi %s911_s27, %s1021_s27  }
   0x3   : > { %p32_p1 = scmp.ge.s32.totalorder %s30_s30, 2  ;;  %p297_p2 = scmp.lt.s32.totalorder %s858_s29, 3 }
   0x5   : > { %s1024_s30 = smov (%p32_p1, %s30_s30), 0  ;;  %p298_p3 = pnand %p749_p0, %p297_p2 }
   0x6   : > { %p342_p4 = scmp.lt.s32.totalorder (!%p298_p3), %s850_s27, 1  ;;  %s860_s24 = smov (!%p298_p3), 96  }
   0x7   : > { %301 = sbr.rel (%p298_p3) target bundleno = 1605 (0x645), region = 52  ;;  %s861_s25 = smov (!%p298_p3), 112  }
   0x8   : > { %s862_s26 = smov (!%p298_p3), 80   ;;  %s864_s13 = smov (!%p298_p3), 16  }
   0xc   : > { %v787_v0 = vld [vmem:[%s1013_s3 + $0x8] sm:$0xff]  ;;  %v786_v2 = vld [vmem:[%s1013_s3] sm:$0xff]  ;;  %s1026_s27 = smov (!%p342_p4, %s850_s27), 1  ;;  %vm384_vm0 = vcmask 261120   ;;  %vm437_vm1 = vcmask 130048   ;;  %vm486_vm2 = vcmask 1043456  }
   0xd   : > { %v789_v1 = vld [vmem:[%s1014_s4 + $0x8] sm:$0xff]  ;;  %394 = vmatpush.bf16.msra.mxu0 %v787_v0  ;;  %v788_v3 = vld [vmem:[%s1014_s4] sm:$0xff]  ;;  %s944_s17 = sshll.u32 %s1026_s27, 2  ;;  %s355_s11 = scalar_lea.vmem %s1012_s2, %s1026_s27  ;;  %v863_v20 = vmov 0   ;;  %vm465_vm6 = vcmask 64512   ;;  %vm504_vm7 = vcmask 125952  }
   0xe   : > { %427 = vmatpush.bf16.msra.mxu1 %v789_v1  ;;  %s348_s20 = scalar_lea.vmem %s1010_s0, %s944_s17  ;;  %s352_s23 = scalar_lea.vmem %s1011_s1, %s944_s17  ;;  %v435_v17 = vld [vmem:[%s355_s11] sm:$0x1]  ;;  %v791_v62 = vld [vmem:[%s1015_s5 + $0x8] sm:$0xff]  ;;  %vm572_vm8 = vcmask 257152   ;;  %vm648_vm13 = vcmask 257024  }
   0xf   : > { %v950_v4 = vld [vmem:[%s348_s20] sm:$0xf]  ;;  %vm436_vm3 = vnez %v435_v17 }
  0x10   : > { %v367_v5 = vld [vmem:[%s352_s23] sm:$0xf]  ;;  %v458_v21 = vsel %vm436_vm3, 16843009, %v863_v20  ;;  %s362_s23 = scalar_lea.vmem %s1018_s8, %s944_s17 }
  0x11   : > { %395 = vmatpush.bf16.msra.mxu0 %v786_v2  ;;  %v459_v22 = vunpack.c.0.s8 %v458_v21  ;;  %v790_v2 = vld [vmem:[%s1015_s5] sm:$0xff] }
  0x12   : > { %428 = vmatpush.bf16.msra.mxu1 %v788_v3 }
  0x13   : > { %vm460_vm4 = vcmp.ne.s32.totalorder %v459_v22, 0 }
  0x14   : > { %761 = vmatmul.msk.bf16.vlgmr.msra.gmra.mxu0 %vm384_vm0, %v950_v4  ;;  %v461_v25 = vsel %vm460_vm4, 1, %v863_v20 }
  0x15   : > { %770 = vmatmul.msk.bf16.vlgmr.msra.gmra.mxu1 %vm384_vm0, %v367_v5  ;;  %v462_v28 = vperm.slane %v461_v25, 0 }
  0x16   : > { %601 = vmatpush.bf16.msrb.mxu1 %v791_v62 }
  0x17   : > { %vm966_vm5 = vcmp.eq.s32.totalorder %v462_v28, 1 }
  0x1a   : > { %602 = vmatpush.bf16.msrb.mxu1 %v790_v2 }
  0x91   : > { %v397_v6 = vpop.f32.mrf.mxu0 }
  0x92   : > { %v430_v7 = vpop.f32.mrf.mxu1  ;;  %v401_v8 = vpack.c.bf16 %v397_v6, %v397_v6  ;;  %v579_v6 = vunpack.c.l.bf16 %v950_v4 }
  0x93   : > { %v434_v9 = vpack.c.bf16 %v430_v7, %v430_v7 }
  0x94   : > { %v507_v12 = vunpack.c.l.b16 %v401_v8 }
  0x95   : > { %v479_v10 = vunpack.c.l.b16 %v434_v9  ;;  %v442_v11 = vsel %vm437_vm1, %v434_v9, 0 }
  0x96   : > { %451 = vmatpush.bf16.xpose.msra.mxu2 %v442_v11  ;;  %v508_v14 = vpack.c.b16 %v507_v12, %v507_v12  ;;  %v865_v11 = vmov 32.0  }
  0x97   : > { %v480_v13 = vpack.c.b16 %v479_v10, %v479_v10 }
  0x98   : > { %509 = vrot.lane.b32.xlu2 %v508_v14, %s861_s25 }
  0x99   : > { %481 = vrot.lane.b32.xlu1 %v480_v13, %s860_s24  ;;  %v399_v15 = vpop.f32.mrf.mxu0 }
  0x9a   : > { %v432_v16 = vpop.f32.mrf.mxu1 }
  0x9d   : > { %771 = vmatmul.msk.bf16.vlgmr.msra.gmra.mxu2 %vm437_vm1, %v401_v8 }
  0xa1   : > { %511 = vrot.lane.b32.xlu1 %v480_v13, %s861_s25 }
  0xa9   : > { %546 = vrot.lane.b32.xlu1 %v480_v13, %s862_s26 }
  0xf2   : > { %v510_v44 = vpop.permute.xlu2 %509 }
 0x10b   : > { %v482_v18 = vpop.permute.xlu1 %481 }
 0x10c   : > { %v488_v19 = vsel %vm486_vm2, %v482_v18, 0 }
 0x10d   : > { %497 = vmatpush.bf16.msra.mxu3 %v488_v19 }
 0x113   : > { %v512_v23 = vpop.permute.xlu1 %511 }
 0x114   : > { %v517_v24 = vsel %vm437_vm1, %v512_v23, 0 }
 0x115   : > { %526 = vmatpush.bf16.xpose.msrb.mxu3 %v517_v24 }
 0x11b   : > { %v547_v26 = vpop.permute.xlu1 %546 }
 0x11c   : > { %v552_v27 = vsel %vm486_vm2, %v547_v26, 0 }
 0x11d   : > { %561 = vmatpush.bf16.msrb.mxu0 %v552_v27 }
 0x120   : > { %v453_v29 = vpop.f32.mrf.mxu2 }
 0x121   : > { %v457_v31 = vmul.f32 0.25, %v453_v29 }
 0x123   : > { %v464_v32 = vsel %vm966_vm5, %v457_v31, -1e+09  ;;  %v822_v31 = vld [vmem:[%s1016_s6] ss:$0 sm:$0xff] }
 0x124   : > { %v466_v33 = vsel %vm465_vm6, %v464_v32, -inf }
 0x125   : > { %467 = vmax.xlane.f32.xlu0 %v466_v33  ;;  %v823_v33 = vld [vmem:[%s1017_s7] ss:$0 sm:$0xff] }
 0x128   : > { %v455_v34 = vpop.f32.mrf.mxu2 }
 0x198   : > { %v468_v35 = vpop.xlane.xlu0 %467 }
 0x199   : > { %v469_v36 = vsub.f32 %v464_v32, %v468_v35 }
 0x19b   : > { %v470_v37 = vmul.f32 1.442695, %v469_v36 }
 0x19d   : > { %824 = vpow2.f32 %v470_v37 }
 0x1a3   : > { %v825_v38 = vpop.eup %824 }
 0x1a4   : > { %v472_v39 = vsel %vm465_vm6, %v825_v38, 0.0 }
 0x1a5   : > { %473 = vadd.xlane.f32.xlu0 %v472_v39 }
 0x218   : > { %v474_v40 = vpop.xlane.xlu0 %473 }
 0x219   : > { %826 = vrcp.f32 %v474_v40 }
 0x21f   : > { %v827_v41 = vpop.eup %826 }
 0x220   : > { %v476_v42 = vmul.f32 %v827_v41, %v825_v38 }
 0x222   : > { %v477_v43 = vpack.c.bf16 %v476_v42, %v476_v42 }
 0x224   : > { %772 = vmatmul.msk.bf16.vlgmr.msra.gmra.mxu3 %vm465_vm6, %v477_v43 }
 0x234   : > { %773 = vmatmul.msk.bf16.vlgmr.msrb.gmra.mxu3 %vm437_vm1, %v510_v44 }
 0x2a7   : > { %v499_v45 = vpop.f32.mrf.mxu3 }
 0x2a8   : > { %v503_v46 = vpack.c.bf16 %v499_v45, %v499_v45 }
 0x2aa   : > { %505 = vst.msk [vmem:[#allocation2] sm:$0xf] %vm504_vm7, %v503_v46 }
 0x2af   : > { %v501_v47 = vpop.f32.mrf.mxu3 }
 0x2b7   : > { %v528_v48 = vpop.f32.mrf.mxu3 }
 0x2b8   : > { %v532_v49 = vmul.f32 0.25, %v528_v48 }
 0x2ba   : > { %v533_v50 = vsel %vm966_vm5, %v532_v49, -1e+09 }
 0x2bb   : > { %v534_v51 = vsel %vm465_vm6, %v533_v50, -inf }
 0x2bc   : > { %535 = vmax.xlane.f32.xlu2 %v534_v51 }
 0x2bf   : > { %v530_v52 = vpop.f32.mrf.mxu3 }
 0x32f   : > { %v536_v53 = vpop.xlane.xlu2 %535 }
 0x330   : > { %v537_v54 = vsub.f32 %v533_v50, %v536_v53 }
 0x332   : > { %v538_v55 = vmul.f32 1.442695, %v537_v54 }
 0x334   : > { %828 = vpow2.f32 %v538_v55 }
 0x33a   : > { %v829_v56 = vpop.eup %828 }
 0x33b   : > { %v540_v57 = vsel %vm465_vm6, %v829_v56, 0.0 }
 0x33c   : > { %541 = vadd.xlane.f32.xlu0 %v540_v57 }
 0x3af   : > { %v542_v58 = vpop.xlane.xlu0 %541 }
 0x3b0   : > { %830 = vrcp.f32 %v542_v58 }
 0x3b1   : > { %832 = vrcp.f32 %v865_v11 }
 0x3b6   : > { %v831_v59 = vpop.eup %830 }
 0x3b7   : > { %v544_v60 = vmul.f32 %v831_v59, %v829_v56  ;;  %v833_v12 = vpop.eup %832 }
 0x3b8   : > { %v614_v13 = vmul.f32 32.0, %v833_v12  ;;  %vm618_vm9 = vweird.f32 %v833_v12 }
 0x3b9   : > { %v545_v61 = vpack.c.bf16 %v544_v60, %v544_v60 }
 0x3ba   : > { %v615_v14 = vsub.f32 1.0, %v614_v13 }
 0x3bb   : > { %774 = vmatmul.msk.bf16.vlgmr.msrb.gmra.mxu0 %vm465_vm6, %v545_v61 }
 0x3bc   : > { %v616_v15 = vmul.f32 %v833_v12, %v615_v14 }
 0x3be   : > { %v617_v16 = vadd.f32 %v833_v12, %v616_v15 }
 0x3c0   : > { %v619_v17 = vsel %vm618_vm9, %v833_v12, %v617_v16 }
 0x438   : > { %v563_v63 = vpop.f32.mrf.mxu0 }
 0x439   : > { %v567_v0 = vpack.c.bf16 %v563_v63, %v563_v63 }
 0x43b   : > { %569 = vrot.lane.b32.xlu0 %v567_v0, %s864_s13 }
 0x440   : > { %v565_v1 = vpop.f32.mrf.mxu0 }
 0x4ad   : > { %v570_v3 = vpop.permute.xlu0 %569 }
 0x4ae   : > { %573 = vst.msk [vmem:[#allocation2] sm:$0xf] %vm572_vm8, %v570_v3 }
 0x4b5   : > { %v574_v5 = vld [vmem:[#allocation2] sm:$0xf] }
 0x4b6   : > { %783 = vmatmul.msk.bf16.vlgmr.msrb.gmra.mxu1 %vm384_vm0, %v574_v5 }
 0x533   : > { %v604_v7 = vpop.f32.mrf.mxu1 }
 0x534   : > { %v605_v8 = vadd.f32 %v604_v7, %v579_v6 }
 0x536   : > { %v610_v9 = vsel %vm384_vm0, %v605_v8, 0.0 }
 0x537   : > { %611 = vadd.xlane.f32.xlu1 %v610_v9 }
 0x53b   : > { %v606_v10 = vpop.f32.mrf.mxu1 }
 0x5aa   : > { %v612_v18 = vpop.xlane.xlu1 %611 }
 0x5ab   : > { %v620_v19 = vmul.f32 %v619_v17, %v612_v18 }
 0x5ad   : > { %v621_v20 = vsub.f32 %v605_v8, %v620_v19 }
 0x5af   : > { %v622_v21 = vmul.f32 %v621_v20, %v621_v20 }
 0x5b1   : > { %v623_v4 = vsel %vm384_vm0, %v622_v21, 0.0 }
 0x5b2   : > { %624 = vadd.xlane.f32.xlu0 %v623_v4 }
 0x625   : > { %v625_v22 = vpop.xlane.xlu0 %624 }
 0x626   : > { %v626_v23 = vmul.f32 %v625_v22, %v619_v17 }
 0x628   : > { %v627_v24 = vadd.f32 1e-06, %v626_v23 }
 0x62a   : > { %834 = vrsqrt.f32 %v627_v24  ;;  %vm634_vm11 = vweird.f32 %v627_v24 }
 0x630   : > { %v835_v25 = vpop.eup %834 }
 0x631   : > { %v629_v26 = vmul.f32 %v835_v25, %v627_v24  ;;  %vm635_vm10 = vweird.f32 %v835_v25 }
 0x632   : > { %vm636_vm12 = vmor %vm634_vm11, %vm635_vm10 }
 0x633   : > { %v630_v27 = vmul.f32 %v835_v25, %v629_v26 }
 0x635   : > { %v631_v28 = vmul.f32 0.5, %v630_v27 }
 0x637   : > { %v632_v29 = vsub.f32 1.5, %v631_v28 }
 0x639   : > { %v633_v30 = vmul.f32 %v835_v25, %v632_v29 }
 0x63b   : > { %v637_v32 = vsel %vm636_vm12, %v835_v25, %v633_v30 }
 0x63c   : > { %v638_v34 = vmul.f32 %v637_v32, %v621_v20 }
 0x63e   : > { %v642_v35 = vmul.f32 %v822_v31, %v638_v34 }
 0x640   : > { %v646_v36 = vadd.f32 %v823_v33, %v642_v35 }
 0x642   : > { %v647_v37 = vpack.c.bf16 %v646_v36, %v646_v36 }
 0x644   : > { %649 = vst.msk [vmem:[%s362_s23] sm:$0xf] %vm648_vm13, %v647_v37 }
 0x645 PF: > { %s18_s29 = sadd.s32 1, %s858_s29   ;;  %s1021_s27 = smov %s854_s28 }
 0x646   : > { %p15_p5 = scmp.ge.s32.totalorder %s18_s29, 4   ;;  %s1022_s28 = smov %s1024_s30 }
 0x648   :  { %17 = sbr.rel (!%p15_p5) target bundleno = 2 (0x2), region = 88 }

</bundles_post_ra>
